<compile_context>
chip_gen: v6e
topology: v6e:2x2x1
jax: 0.10.0
libtpu: 0.0.40
codegen_flags: <defaults>
</compile_context>

<pallas_src>
import functools

import jax
import jax.numpy as jnp
from jax import lax
from jax.experimental import pallas as pl
from jax.experimental.pallas import tpu as pltpu

KERNEL_SIZE = 25   # moving-average kernel size from the PyTorch module
NUM_BLOCKS = 3     # xLSTM stack depth


def _full_spec(shape):
    n = len(shape)
    return pl.BlockSpec(shape, lambda b, _n=n: (0,) * _n)


# --------------------------------------------------------------------------- #
# Fused kernel: decomposition + (seasonal|trend|mm fold) + 3 mLSTM blocks
#               + post-LN + mm2 (+ transpose + channel slice)
# --------------------------------------------------------------------------- #
def fused_model_kernel(x_ref, band_ref, tri_ref,
                       wst_ref, bst_ref,
                       gamma_ref, beta_ref, wqkvo_ref, bo_ref,
                       wif_ref, bif_ref, wp_ref,
                       pg_ref, pb_ref, wmm2T_ref, bmm2_ref,
                       o_ref):
    f32 = jnp.float32
    bf16 = jnp.bfloat16

    x = x_ref[...].astype(f32)                              # (C, L)
    C, L = x.shape
    E = wst_ref.shape[1]
    pad = (KERNEL_SIZE - 1) // 2

    # ---- series decomposition (replicate-pad + moving average via band matmul)
    front = jnp.broadcast_to(x[:, 0:1], (C, pad))
    end = jnp.broadcast_to(x[:, L - 1:L], (C, pad))
    xp = jnp.concatenate([front, x, end], axis=1)           # (C, L + 2*pad)
    mean = jnp.dot(xp, band_ref[...],
                   preferred_element_type=f32) * (1.0 / KERNEL_SIZE)   # (C, L)
    res = x - mean                                          # seasonal residual

    # ---- Linear_Seasonal + Linear_Trend + mm folded into ONE matmul
    # h = [res | mean] @ ([Ws;Wt] @ Wmm) + ((bs+bt) @ Wmm + bmm)   (exact fold)
    feat = jnp.concatenate([res, mean], axis=1).astype(bf16)          # (C, 2L)
    h = jnp.dot(feat, wst_ref[...],
                preferred_element_type=f32) + bst_ref[...]            # (C, E)

    tri = tri_ref[...]                                      # (C, C) lower-tri ones
    causal = tri > 0.0
    inv_sqrt_e = 1.0 / (E ** 0.5)

    # ---- simplified xLSTM (parallel mLSTM) blocks, pre-LN + residual
    for blk in range(NUM_BLOCKS):
        mu = jnp.mean(h, axis=1, keepdims=True)
        var = jnp.mean((h - mu) ** 2, axis=1, keepdims=True)
        xn = (h - mu) * lax.rsqrt(var + 1e-5) * gamma_ref[blk] + beta_ref[blk]

        # fused Q/K/V/O projection: one lane-exact (C,E)x(E,4E)=(8,32)x(32,128)
        qkvo = jnp.dot(xn.astype(bf16), wqkvo_ref[blk],
                       preferred_element_type=f32)          # (C, 4E)
        q = qkvo[:, 0:E]
        k = qkvo[:, E:2 * E] * inv_sqrt_e
        v = qkvo[:, 2 * E:3 * E]
        og = jax.nn.sigmoid(qkvo[:, 3 * E:4 * E] + bo_ref[blk])

        # fused input/forget gates (tiny (E,2) projection, f32)
        gates = jnp.dot(xn, wif_ref[blk],
                        preferred_element_type=f32) + bif_ref[blk]    # (C, 2)
        igate = gates[:, 0:1]
        fgate = gates[:, 1:2]
        logf = -jax.nn.softplus(-fgate)                     # log(sigmoid(f))

        # inclusive cumsum of log forget gates via precomputed lower-tri matmul
        fcum = jnp.dot(tri, logf, preferred_element_type=f32)        # (C, 1)

        # log-space decay matrix D[t,s] = F_t - F_s + i_s (causal), row-max stable
        D = fcum - fcum.T + igate.T
        D = jnp.where(causal, D, -jnp.inf)
        m = jnp.max(D, axis=1, keepdims=True)
        Dt = jnp.exp(D - m)

        qk = lax.dot_general(q, k, (((1,), (1,)), ((), ())),
                             preferred_element_type=f32)    # (C, C)
        scores = qk * Dt
        denom = jnp.maximum(jnp.abs(jnp.sum(scores, axis=1, keepdims=True)),
                            jnp.exp(-m))
        sc = scores * pl.reciprocal(denom, approx=True)
        h_tilde = jnp.dot(sc, v, preferred_element_type=f32)         # (C, E)

        h = h + jnp.dot((og * h_tilde).astype(bf16), wp_ref[blk],
                        preferred_element_type=f32)

    # ---- post-blocks LayerNorm + mm2 (E -> T), emitted already transposed
    mu = jnp.mean(h, axis=1, keepdims=True)
    var = jnp.mean((h - mu) ** 2, axis=1, keepdims=True)
    xn = (h - mu) * lax.rsqrt(var + 1e-5) * pg_ref[...] + pb_ref[...]  # (C, E)
    # outT[t, c] = sum_e wmm2T[e, t] * xn[c, e]   -> (T, C)
    outT = lax.dot_general(wmm2T_ref[...], xn.astype(bf16),
                           (((0,), (1,)), ((), ())),
                           preferred_element_type=f32) + bmm2_ref[...]
    # permute(0,2,1) + [:, :, :3] folded in: write only the 3 kept channels
    o_ref[...] = outT[:, 0:3].astype(o_ref.dtype)           # (T, 3)


# --------------------------------------------------------------------------- #
# Wrapper
# --------------------------------------------------------------------------- #
def model_forward(x, params):
    # x: (B, 1, C, L) like the PyTorch input; squeeze the singleton dim.
    x = x[:, 0]                                             # (B, C, L)
    B, C, L = x.shape
    E = params["wst_comb"].shape[1]
    T = params["wmm2T"].shape[1]
    Lp = params["band"].shape[0]
    NB = params["wqkvo"].shape[0]

    return pl.pallas_call(
        fused_model_kernel,
        out_shape=jax.ShapeDtypeStruct((B, T, 3), jnp.float32),
        grid=(B,),
        in_specs=[
            pl.BlockSpec((None, C, L), lambda b: (b, 0, 0)),   # x (per batch)
            _full_spec((Lp, L)),                               # band (mov.avg)
            _full_spec((C, C)),                                # tri (causal)
            _full_spec((2 * L, E)), _full_spec((1, E)),        # folded seas/trend/mm
            _full_spec((NB, 1, E)), _full_spec((NB, 1, E)),    # LN gamma/beta
            _full_spec((NB, E, 4 * E)),                        # fused Wq|Wk|Wv|Wo
            _full_spec((NB, 1, E)),                            # output-gate bias
            _full_spec((NB, E, 2)), _full_spec((NB, 1, 2)),    # fused i/f gates
            _full_spec((NB, E, E)),                            # block out proj
            _full_spec((1, E)), _full_spec((1, E)),            # post-LN
            _full_spec((E, T)), _full_spec((T, 1)),            # mm2
        ],
        out_specs=pl.BlockSpec((None, T, 3), lambda b: (b, 0, 0)),
        compiler_params=pltpu.CompilerParams(
            dimension_semantics=("parallel",)),
    )(x, params["band"], params["tri"],
      params["wst_comb"], params["bst_comb"],
      params["gamma"], params["beta"], params["wqkvo"], params["bo"],
      params["wif"], params["bif"], params["wp"],
      params["post_gamma"], params["post_beta"],
      params["wmm2T"], params["bmm2col"])


# --------------------------------------------------------------------------- #
# Parameter init (deterministic, in-script); host-side weight folding done here
# --------------------------------------------------------------------------- #
def init_params(key, enc_in, context_points, target_points, n2,
                num_blocks=NUM_BLOCKS):
    L, T, E, C = context_points, target_points, n2, enc_in
    NB = num_blocks
    keys = jax.random.split(key, 10)

    def rnd(k, shape, scale):
        return (scale * jax.random.normal(k, shape)).astype(jnp.float32)

    # precomputed constants (moving-average band, causal lower-triangular)
    pad = (KERNEL_SIZE - 1) // 2
    Lp = L + 2 * pad
    j = jnp.arange(Lp)[:, None]
    t = jnp.arange(L)[None, :]
    band = ((j >= t) & (j < t + KERNEL_SIZE)).astype(jnp.float32)   # (Lp, L)
    ii = jnp.arange(C)[:, None]
    jj = jnp.arange(C)[None, :]
    tri = (jj <= ii).astype(jnp.float32)                            # (C, C)

    # original-module parameters (f32), then folded exactly for the kernel:
    #   h = [res | mean] @ ([Ws;Wt] @ Wmm) + ((bs+bt) @ Wmm + bmm)
    wsT = jnp.full((L, T), 1.0 / L, jnp.float32)    # Linear_Seasonal.weight^T
    wtT = jnp.full((L, T), 1.0 / L, jnp.float32)    # Linear_Trend.weight^T
    bs = rnd(keys[0], (1, T), 0.02)
    bt = rnd(keys[1], (1, T), 0.02)
    wmmT = rnd(keys[2], (T, E), 1.0 / float(T) ** 0.5)
    bmm = rnd(keys[3], (1, E), 0.02)
    wst_comb = (jnp.concatenate([wsT, wtT], axis=0) @ wmmT).astype(jnp.bfloat16)
    bst_comb = (bs + bt) @ wmmT + bmm                               # (1, E) f32

    params = {
        "band": band,
        "tri": tri,
        "wst_comb": wst_comb,                                       # (2L, E)
        "bst_comb": bst_comb,                                       # (1, E)
        # stacked (over blocks) simplified-mLSTM parameters
        "gamma": jnp.ones((NB, 1, E), jnp.float32),
        "beta": jnp.zeros((NB, 1, E), jnp.float32),
        "wqkvo": rnd(keys[4], (NB, E, 4 * E),
                     1.0 / float(E) ** 0.5).astype(jnp.bfloat16),
        "bo": jnp.zeros((NB, 1, E), jnp.float32),
        "wif": rnd(keys[5], (NB, E, 2), 1.0 / float(E) ** 0.5),
        "bif": jnp.concatenate(
            [jnp.zeros((NB, 1, 1), jnp.float32),              # input-gate bias 0
             jnp.full((NB, 1, 1), 2.0, jnp.float32)], axis=-1),  # forget bias 2
        "wp": rnd(keys[6], (NB, E, E), 1.0 / float(E) ** 0.5).astype(jnp.bfloat16),
        # post-blocks norm + mm2
        "post_gamma": jnp.ones((1, E), jnp.float32),
        "post_beta": jnp.zeros((1, E), jnp.float32),
        "wmm2T": rnd(keys[7], (E, T), 1.0 / float(E) ** 0.5).astype(jnp.bfloat16),
        "bmm2col": rnd(keys[8], (T, 1), 0.02),
    }
    return params


if __name__ == "__main__":
    # small shapes consistent with the forward pass
    B, enc_in, context_points, target_points, n2 = 2, 8, 32, 16, 32

    key = jax.random.PRNGKey(0)
    kx, kp = jax.random.split(key)
    x = jax.random.normal(kx, (B, 1, enc_in, context_points), dtype=jnp.float32)
    params = init_params(kp, enc_in, context_points, target_points, n2)

    fwd = jax.jit(functools.partial(model_forward, params=params))
    out = jax.block_until_ready(fwd(x))

    assert out.shape == (B, target_points, 3), out.shape
    assert jnp.all(jnp.isfinite(out))
    print("KERNEL_OK")
</pallas_src>

<mosaic_0001>
module attributes {stable_mosaic.version = 11 : i64} {
  func.func @fused_model_kernel(%arg0: i32, %arg1: memref<1x8x32xf32, #tpu.memory_space<vmem>>, %arg2: memref<56x32xf32, #tpu.memory_space<vmem>>, %arg3: memref<8x8xf32, #tpu.memory_space<vmem>>, %arg4: memref<64x32xbf16, #tpu.memory_space<vmem>>, %arg5: memref<1x32xf32, #tpu.memory_space<vmem>>, %arg6: memref<3x1x32xf32, #tpu.memory_space<vmem>>, %arg7: memref<3x1x32xf32, #tpu.memory_space<vmem>>, %arg8: memref<3x32x128xbf16, #tpu.memory_space<vmem>>, %arg9: memref<3x1x32xf32, #tpu.memory_space<vmem>>, %arg10: memref<3x32x2xf32, #tpu.memory_space<vmem>>, %arg11: memref<3x1x2xf32, #tpu.memory_space<vmem>>, %arg12: memref<3x32x32xbf16, #tpu.memory_space<vmem>>, %arg13: memref<1x32xf32, #tpu.memory_space<vmem>>, %arg14: memref<1x32xf32, #tpu.memory_space<vmem>>, %arg15: memref<32x16xbf16, #tpu.memory_space<vmem>>, %arg16: memref<16x1xf32, #tpu.memory_space<vmem>>, %arg17: memref<1x16x3xf32, #tpu.memory_space<vmem>>) attributes {dimension_semantics = [#tpu.dimension_semantics<parallel>], iteration_bounds = array<i64: 2>, scalar_prefetch = 0 : i64, scratch_operands = 0 : i64, tpu.core_type = #tpu.core_type<tc>, window_params = [{transform_indices = @transform_0, window_bounds = array<i64: 1, 8, 32>}, {pipeline_mode = #tpu.pipeline_mode<synchronous>, transform_indices = @transform_1, window_bounds = array<i64: 56, 32>}, {pipeline_mode = #tpu.pipeline_mode<synchronous>, transform_indices = @transform_2, window_bounds = array<i64: 8, 8>}, {pipeline_mode = #tpu.pipeline_mode<synchronous>, transform_indices = @transform_3, window_bounds = array<i64: 64, 32>}, {pipeline_mode = #tpu.pipeline_mode<synchronous>, transform_indices = @transform_4, window_bounds = array<i64: 1, 32>}, {pipeline_mode = #tpu.pipeline_mode<synchronous>, transform_indices = @transform_5, window_bounds = array<i64: 3, 1, 32>}, {pipeline_mode = #tpu.pipeline_mode<synchronous>, transform_indices = @transform_6, window_bounds = array<i64: 3, 1, 32>}, {pipeline_mode = #tpu.pipeline_mode<synchronous>, transform_indices = @transform_7, window_bounds = array<i64: 3, 32, 128>}, {pipeline_mode = #tpu.pipeline_mode<synchronous>, transform_indices = @transform_8, window_bounds = array<i64: 3, 1, 32>}, {pipeline_mode = #tpu.pipeline_mode<synchronous>, transform_indices = @transform_9, window_bounds = array<i64: 3, 32, 2>}, {pipeline_mode = #tpu.pipeline_mode<synchronous>, transform_indices = @transform_10, window_bounds = array<i64: 3, 1, 2>}, {pipeline_mode = #tpu.pipeline_mode<synchronous>, transform_indices = @transform_11, window_bounds = array<i64: 3, 32, 32>}, {pipeline_mode = #tpu.pipeline_mode<synchronous>, transform_indices = @transform_12, window_bounds = array<i64: 1, 32>}, {pipeline_mode = #tpu.pipeline_mode<synchronous>, transform_indices = @transform_13, window_bounds = array<i64: 1, 32>}, {pipeline_mode = #tpu.pipeline_mode<synchronous>, transform_indices = @transform_14, window_bounds = array<i64: 32, 16>}, {pipeline_mode = #tpu.pipeline_mode<synchronous>, transform_indices = @transform_15, window_bounds = array<i64: 16, 1>}, {transform_indices = @transform_16, window_bounds = array<i64: 1, 16, 3>}]} {
    %c0 = arith.constant 0 : index
    %c0_0 = arith.constant 0 : index
    %c0_1 = arith.constant 0 : index
    %0 = vector.load %arg1[%c0, %c0_0, %c0_1] : memref<1x8x32xf32, #tpu.memory_space<vmem>>, vector<1x8x32xf32>
    %1 = vector.shape_cast %0 : vector<1x8x32xf32> to vector<8x32xf32>
    %2 = vector.extract_strided_slice %1 {offsets = [0, 0], sizes = [8, 1], strides = [1, 1]} : vector<8x32xf32> to vector<8x1xf32>
    %3 = vector.shape_cast %2 : vector<8x1xf32> to vector<8x1xf32>
    %4 = vector.broadcast %3 : vector<8x1xf32> to vector<8x12xf32>
    %5 = vector.extract_strided_slice %1 {offsets = [0, 31], sizes = [8, 1], strides = [1, 1]} : vector<8x32xf32> to vector<8x1xf32>
    %6 = vector.shape_cast %5 : vector<8x1xf32> to vector<8x1xf32>
    %7 = vector.broadcast %6 : vector<8x1xf32> to vector<8x12xf32>
    %8 = tpu.concatenate %4, %1, %7 in 1 : vector<8x12xf32>, vector<8x32xf32>, vector<8x12xf32> -> vector<8x56xf32>
    %c0_2 = arith.constant 0 : index
    %c0_3 = arith.constant 0 : index
    %9 = vector.load %arg2[%c0_2, %c0_3] : memref<56x32xf32, #tpu.memory_space<vmem>>, vector<56x32xf32>
    %cst = arith.constant dense<0.000000e+00> : vector<8x32xf32>
    %10 = tpu.matmul %8, %9, %cst {dimension_numbers = #tpu.dot_dimension_numbers<[1], [0], [0], [1], [0, 0, 1, 1], [], []>} : vector<8x56xf32>, vector<56x32xf32>, vector<8x32xf32> -> vector<8x32xf32>
    %cst_4 = arith.constant 4.000000e-02 : f32
    %11 = vector.broadcast %cst_4 : f32 to vector<8x32xf32>
    %12 = arith.mulf %10, %11 : vector<8x32xf32>
    %13 = arith.subf %1, %12 : vector<8x32xf32>
    %14 = tpu.concatenate %13, %12 in 1 : vector<8x32xf32>, vector<8x32xf32> -> vector<8x64xf32>
    %15 = arith.truncf %14 : vector<8x64xf32> to vector<8x64xbf16>
    %c0_5 = arith.constant 0 : index
    %c0_6 = arith.constant 0 : index
    %16 = vector.load %arg4[%c0_5, %c0_6] : memref<64x32xbf16, #tpu.memory_space<vmem>>, vector<64x32xbf16>
    %cst_7 = arith.constant dense<0.000000e+00> : vector<8x32xf32>
    %17 = tpu.matmul %15, %16, %cst_7 {dimension_numbers = #tpu.dot_dimension_numbers<[1], [0], [0], [1], [0, 0, 1, 1], [], []>} : vector<8x64xbf16>, vector<64x32xbf16>, vector<8x32xf32> -> vector<8x32xf32>
    %c0_8 = arith.constant 0 : index
    %c0_9 = arith.constant 0 : index
    %18 = vector.load %arg5[%c0_8, %c0_9] : memref<1x32xf32, #tpu.memory_space<vmem>>, vector<1x32xf32>
    %19 = vector.broadcast %18 : vector<1x32xf32> to vector<8x32xf32>
    %20 = arith.addf %17, %19 : vector<8x32xf32>
    %c0_10 = arith.constant 0 : index
    %c0_11 = arith.constant 0 : index
    %21 = vector.load %arg3[%c0_10, %c0_11] : memref<8x8xf32, #tpu.memory_space<vmem>>, vector<8x8xf32>
    %cst_12 = arith.constant 0.000000e+00 : f32
    %22 = vector.broadcast %cst_12 : f32 to vector<8x8xf32>
    %23 = arith.cmpf ogt, %21, %22 : vector<8x8xf32>
    %cst_13 = arith.constant dense<0.000000e+00> : vector<8xf32>
    %24 = vector.multi_reduction <add>, %20, %cst_13 [1] : vector<8x32xf32> to vector<8xf32>
    %25 = vector.shape_cast %24 : vector<8xf32> to vector<8x1xf32>
    %cst_14 = arith.constant 3.200000e+01 : f32
    %26 = vector.broadcast %cst_14 : f32 to vector<8x1xf32>
    %27 = arith.divf %25, %26 : vector<8x1xf32>
    %28 = vector.broadcast %27 : vector<8x1xf32> to vector<8x32xf32>
    %29 = arith.subf %20, %28 : vector<8x32xf32>
    %30 = arith.mulf %29, %29 : vector<8x32xf32>
    %cst_15 = arith.constant dense<0.000000e+00> : vector<8xf32>
    %31 = vector.multi_reduction <add>, %30, %cst_15 [1] : vector<8x32xf32> to vector<8xf32>
    %32 = vector.shape_cast %31 : vector<8xf32> to vector<8x1xf32>
    %cst_16 = arith.constant 3.200000e+01 : f32
    %33 = vector.broadcast %cst_16 : f32 to vector<8x1xf32>
    %34 = arith.divf %32, %33 : vector<8x1xf32>
    %35 = vector.broadcast %27 : vector<8x1xf32> to vector<8x32xf32>
    %36 = arith.subf %20, %35 : vector<8x32xf32>
    %cst_17 = arith.constant 9.99999974E-6 : f32
    %37 = vector.broadcast %cst_17 : f32 to vector<8x1xf32>
    %38 = arith.addf %34, %37 : vector<8x1xf32>
    %39 = math.rsqrt %38 : vector<8x1xf32>
    %40 = vector.broadcast %39 : vector<8x1xf32> to vector<8x32xf32>
    %41 = arith.mulf %36, %40 : vector<8x32xf32>
    %c0_18 = arith.constant 0 : index
    %c0_19 = arith.constant 0 : index
    %c0_20 = arith.constant 0 : index
    %42 = vector.load %arg6[%c0_18, %c0_19, %c0_20] : memref<3x1x32xf32, #tpu.memory_space<vmem>>, vector<1x1x32xf32>
    %43 = vector.shape_cast %42 : vector<1x1x32xf32> to vector<1x32xf32>
    %44 = vector.broadcast %43 : vector<1x32xf32> to vector<8x32xf32>
    %45 = arith.mulf %41, %44 : vector<8x32xf32>
    %c0_21 = arith.constant 0 : index
    %c0_22 = arith.constant 0 : index
    %c0_23 = arith.constant 0 : index
    %46 = vector.load %arg7[%c0_21, %c0_22, %c0_23] : memref<3x1x32xf32, #tpu.memory_space<vmem>>, vector<1x1x32xf32>
    %47 = vector.shape_cast %46 : vector<1x1x32xf32> to vector<1x32xf32>
    %48 = vector.broadcast %47 : vector<1x32xf32> to vector<8x32xf32>
    %49 = arith.addf %45, %48 : vector<8x32xf32>
    %50 = arith.truncf %49 : vector<8x32xf32> to vector<8x32xbf16>
    %c0_24 = arith.constant 0 : index
    %c0_25 = arith.constant 0 : index
    %c0_26 = arith.constant 0 : index
    %51 = vector.load %arg8[%c0_24, %c0_25, %c0_26] : memref<3x32x128xbf16, #tpu.memory_space<vmem>>, vector<1x32x128xbf16>
    %52 = vector.shape_cast %51 : vector<1x32x128xbf16> to vector<32x128xbf16>
    %cst_27 = arith.constant dense<0.000000e+00> : vector<8x128xf32>
    %53 = tpu.matmul %50, %52, %cst_27 {dimension_numbers = #tpu.dot_dimension_numbers<[1], [0], [0], [1], [0, 0, 1, 1], [], []>} : vector<8x32xbf16>, vector<32x128xbf16>, vector<8x128xf32> -> vector<8x128xf32>
    %54 = vector.extract_strided_slice %53 {offsets = [0, 0], sizes = [8, 32], strides = [1, 1]} : vector<8x128xf32> to vector<8x32xf32>
    %55 = vector.extract_strided_slice %53 {offsets = [0, 32], sizes = [8, 32], strides = [1, 1]} : vector<8x128xf32> to vector<8x32xf32>
    %cst_28 = arith.constant 0.176776692 : f32
    %56 = vector.broadcast %cst_28 : f32 to vector<8x32xf32>
    %57 = arith.mulf %55, %56 : vector<8x32xf32>
    %58 = vector.extract_strided_slice %53 {offsets = [0, 64], sizes = [8, 32], strides = [1, 1]} : vector<8x128xf32> to vector<8x32xf32>
    %59 = vector.extract_strided_slice %53 {offsets = [0, 96], sizes = [8, 32], strides = [1, 1]} : vector<8x128xf32> to vector<8x32xf32>
    %c0_29 = arith.constant 0 : index
    %c0_30 = arith.constant 0 : index
    %c0_31 = arith.constant 0 : index
    %60 = vector.load %arg9[%c0_29, %c0_30, %c0_31] : memref<3x1x32xf32, #tpu.memory_space<vmem>>, vector<1x1x32xf32>
    %61 = vector.shape_cast %60 : vector<1x1x32xf32> to vector<1x32xf32>
    %62 = vector.broadcast %61 : vector<1x32xf32> to vector<8x32xf32>
    %63 = arith.addf %59, %62 : vector<8x32xf32>
    %64 = arith.negf %63 : vector<8x32xf32>
    %65 = math.exp %64 : vector<8x32xf32>
    %cst_32 = arith.constant 1.000000e+00 : f32
    %66 = vector.broadcast %cst_32 : f32 to vector<8x32xf32>
    %67 = arith.addf %66, %65 : vector<8x32xf32>
    %68 = arith.divf %66, %67 : vector<8x32xf32>
    %c0_33 = arith.constant 0 : index
    %c0_34 = arith.constant 0 : index
    %c0_35 = arith.constant 0 : index
    %69 = vector.load %arg10[%c0_33, %c0_34, %c0_35] : memref<3x32x2xf32, #tpu.memory_space<vmem>>, vector<1x32x2xf32>
    %70 = vector.shape_cast %69 : vector<1x32x2xf32> to vector<32x2xf32>
    %cst_36 = arith.constant dense<0.000000e+00> : vector<8x2xf32>
    %71 = tpu.matmul %49, %70, %cst_36 {dimension_numbers = #tpu.dot_dimension_numbers<[1], [0], [0], [1], [0, 0, 1, 1], [], []>} : vector<8x32xf32>, vector<32x2xf32>, vector<8x2xf32> -> vector<8x2xf32>
    %c0_37 = arith.constant 0 : index
    %c0_38 = arith.constant 0 : index
    %c0_39 = arith.constant 0 : index
    %72 = vector.load %arg11[%c0_37, %c0_38, %c0_39] : memref<3x1x2xf32, #tpu.memory_space<vmem>>, vector<1x1x2xf32>
    %73 = vector.shape_cast %72 : vector<1x1x2xf32> to vector<1x2xf32>
    %74 = vector.broadcast %73 : vector<1x2xf32> to vector<8x2xf32>
    %75 = arith.addf %71, %74 : vector<8x2xf32>
    %76 = vector.extract_strided_slice %75 {offsets = [0, 0], sizes = [8, 1], strides = [1, 1]} : vector<8x2xf32> to vector<8x1xf32>
    %77 = vector.extract_strided_slice %75 {offsets = [0, 1], sizes = [8, 1], strides = [1, 1]} : vector<8x2xf32> to vector<8x1xf32>
    %cst_40 = arith.constant 0.000000e+00 : f32
    %78 = vector.broadcast %cst_40 : f32 to vector<8x1xf32>
    %79 = arith.subf %78, %77 : vector<8x1xf32>
    %cst_41 = arith.constant 0.000000e+00 : f32
    %80 = vector.broadcast %cst_41 : f32 to vector<8x1xf32>
    %81 = arith.maximumf %79, %80 : vector<8x1xf32>
    %82 = vector.broadcast %cst_41 : f32 to vector<8x1xf32>
    %83 = arith.subf %79, %82 : vector<8x1xf32>
    %84 = arith.cmpf one, %83, %83 : vector<8x1xf32>
    %85 = vector.broadcast %cst_41 : f32 to vector<8x1xf32>
    %86 = arith.addf %79, %85 : vector<8x1xf32>
    %87 = math.absf %83 : vector<8x1xf32>
    %cst_42 = arith.constant 0.000000e+00 : f32
    %88 = vector.broadcast %cst_42 : f32 to vector<8x1xf32>
    %89 = arith.subf %88, %87 : vector<8x1xf32>
    %90 = math.exp %89 : vector<8x1xf32>
    %91 = math.log1p %90 : vector<8x1xf32>
    %92 = arith.addf %81, %91 : vector<8x1xf32>
    %93 = arith.select %84, %86, %92 : vector<8x1xi1>, vector<8x1xf32>
    %cst_43 = arith.constant 0.000000e+00 : f32
    %94 = vector.broadcast %cst_43 : f32 to vector<8x1xf32>
    %95 = arith.subf %94, %93 : vector<8x1xf32>
    %cst_44 = arith.constant dense<0.000000e+00> : vector<8x1xf32>
    %96 = tpu.matmul %21, %95, %cst_44 {dimension_numbers = #tpu.dot_dimension_numbers<[1], [0], [0], [1], [0, 0, 1, 1], [], []>} : vector<8x8xf32>, vector<8x1xf32>, vector<8x1xf32> -> vector<8x1xf32>
    %97 = tpu.transpose %96, [1, 0] : vector<8x1xf32> -> vector<1x8xf32>
    %98 = vector.broadcast %96 : vector<8x1xf32> to vector<8x8xf32>
    %99 = vector.broadcast %97 : vector<1x8xf32> to vector<8x8xf32>
    %100 = arith.subf %98, %99 : vector<8x8xf32>
    %101 = tpu.transpose %76, [1, 0] : vector<8x1xf32> -> vector<1x8xf32>
    %102 = vector.broadcast %101 : vector<1x8xf32> to vector<8x8xf32>
    %103 = arith.addf %100, %102 : vector<8x8xf32>
    %cst_45 = arith.constant 0xFF800000 : f32
    %104 = vector.broadcast %cst_45 : f32 to vector<8x8xf32>
    %105 = arith.select %23, %103, %104 : vector<8x8xi1>, vector<8x8xf32>
    %cst_46 = arith.constant dense<0xFF800000> : vector<8xf32>
    %106 = vector.multi_reduction <maximumf>, %105, %cst_46 [1] : vector<8x8xf32> to vector<8xf32>
    %107 = vector.shape_cast %106 : vector<8xf32> to vector<8x1xf32>
    %108 = vector.broadcast %107 : vector<8x1xf32> to vector<8x8xf32>
    %109 = arith.subf %105, %108 : vector<8x8xf32>
    %110 = math.exp %109 : vector<8x8xf32>
    %cst_47 = arith.constant dense<0.000000e+00> : vector<8x8xf32>
    %111 = tpu.matmul %54, %57, %cst_47 {dimension_numbers = #tpu.dot_dimension_numbers<[1], [1], [0], [0], [0, 0, 1, 0], [], []>} : vector<8x32xf32>, vector<8x32xf32>, vector<8x8xf32> -> vector<8x8xf32>
    %112 = arith.mulf %111, %110 : vector<8x8xf32>
    %cst_48 = arith.constant dense<0.000000e+00> : vector<8xf32>
    %113 = vector.multi_reduction <add>, %112, %cst_48 [1] : vector<8x8xf32> to vector<8xf32>
    %114 = vector.shape_cast %113 : vector<8xf32> to vector<8x1xf32>
    %115 = math.absf %114 : vector<8x1xf32>
    %cst_49 = arith.constant 0.000000e+00 : f32
    %116 = vector.broadcast %cst_49 : f32 to vector<8x1xf32>
    %117 = arith.subf %116, %107 : vector<8x1xf32>
    %118 = math.exp %117 : vector<8x1xf32>
    %119 = arith.maximumf %115, %118 : vector<8x1xf32>
    %120 = tpu.reciprocal %119 {approx = true} : vector<8x1xf32> -> vector<8x1xf32>
    %121 = vector.broadcast %120 : vector<8x1xf32> to vector<8x8xf32>
    %122 = arith.mulf %112, %121 : vector<8x8xf32>
    %cst_50 = arith.constant dense<0.000000e+00> : vector<8x32xf32>
    %123 = tpu.matmul %122, %58, %cst_50 {dimension_numbers = #tpu.dot_dimension_numbers<[1], [0], [0], [1], [0, 0, 1, 1], [], []>} : vector<8x8xf32>, vector<8x32xf32>, vector<8x32xf32> -> vector<8x32xf32>
    %124 = arith.mulf %68, %123 : vector<8x32xf32>
    %125 = arith.truncf %124 : vector<8x32xf32> to vector<8x32xbf16>
    %c0_51 = arith.constant 0 : index
    %c0_52 = arith.constant 0 : index
    %c0_53 = arith.constant 0 : index
    %126 = vector.load %arg12[%c0_51, %c0_52, %c0_53] : memref<3x32x32xbf16, #tpu.memory_space<vmem>>, vector<1x32x32xbf16>
    %127 = vector.shape_cast %126 : vector<1x32x32xbf16> to vector<32x32xbf16>
    %cst_54 = arith.constant dense<0.000000e+00> : vector<8x32xf32>
    %128 = tpu.matmul %125, %127, %cst_54 {dimension_numbers = #tpu.dot_dimension_numbers<[1], [0], [0], [1], [0, 0, 1, 1], [], []>} : vector<8x32xbf16>, vector<32x32xbf16>, vector<8x32xf32> -> vector<8x32xf32>
    %129 = arith.addf %20, %128 : vector<8x32xf32>
    %cst_55 = arith.constant dense<0.000000e+00> : vector<8xf32>
    %130 = vector.multi_reduction <add>, %129, %cst_55 [1] : vector<8x32xf32> to vector<8xf32>
    %131 = vector.shape_cast %130 : vector<8xf32> to vector<8x1xf32>
    %cst_56 = arith.constant 3.200000e+01 : f32
    %132 = vector.broadcast %cst_56 : f32 to vector<8x1xf32>
    %133 = arith.divf %131, %132 : vector<8x1xf32>
    %134 = vector.broadcast %133 : vector<8x1xf32> to vector<8x32xf32>
    %135 = arith.subf %129, %134 : vector<8x32xf32>
    %136 = arith.mulf %135, %135 : vector<8x32xf32>
    %cst_57 = arith.constant dense<0.000000e+00> : vector<8xf32>
    %137 = vector.multi_reduction <add>, %136, %cst_57 [1] : vector<8x32xf32> to vector<8xf32>
    %138 = vector.shape_cast %137 : vector<8xf32> to vector<8x1xf32>
    %cst_58 = arith.constant 3.200000e+01 : f32
    %139 = vector.broadcast %cst_58 : f32 to vector<8x1xf32>
    %140 = arith.divf %138, %139 : vector<8x1xf32>
    %141 = vector.broadcast %133 : vector<8x1xf32> to vector<8x32xf32>
    %142 = arith.subf %129, %141 : vector<8x32xf32>
    %cst_59 = arith.constant 9.99999974E-6 : f32
    %143 = vector.broadcast %cst_59 : f32 to vector<8x1xf32>
    %144 = arith.addf %140, %143 : vector<8x1xf32>
    %145 = math.rsqrt %144 : vector<8x1xf32>
    %146 = vector.broadcast %145 : vector<8x1xf32> to vector<8x32xf32>
    %147 = arith.mulf %142, %146 : vector<8x32xf32>
    %c1 = arith.constant 1 : index
    %c0_60 = arith.constant 0 : index
    %c0_61 = arith.constant 0 : index
    %148 = vector.load %arg6[%c1, %c0_60, %c0_61] : memref<3x1x32xf32, #tpu.memory_space<vmem>>, vector<1x1x32xf32>
    %149 = vector.shape_cast %148 : vector<1x1x32xf32> to vector<1x32xf32>
    %150 = vector.broadcast %149 : vector<1x32xf32> to vector<8x32xf32>
    %151 = arith.mulf %147, %150 : vector<8x32xf32>
    %c1_62 = arith.constant 1 : index
    %c0_63 = arith.constant 0 : index
    %c0_64 = arith.constant 0 : index
    %152 = vector.load %arg7[%c1_62, %c0_63, %c0_64] : memref<3x1x32xf32, #tpu.memory_space<vmem>>, vector<1x1x32xf32>
    %153 = vector.shape_cast %152 : vector<1x1x32xf32> to vector<1x32xf32>
    %154 = vector.broadcast %153 : vector<1x32xf32> to vector<8x32xf32>
    %155 = arith.addf %151, %154 : vector<8x32xf32>
    %156 = arith.truncf %155 : vector<8x32xf32> to vector<8x32xbf16>
    %c1_65 = arith.constant 1 : index
    %c0_66 = arith.constant 0 : index
    %c0_67 = arith.constant 0 : index
    %157 = vector.load %arg8[%c1_65, %c0_66, %c0_67] : memref<3x32x128xbf16, #tpu.memory_space<vmem>>, vector<1x32x128xbf16>
    %158 = vector.shape_cast %157 : vector<1x32x128xbf16> to vector<32x128xbf16>
    %cst_68 = arith.constant dense<0.000000e+00> : vector<8x128xf32>
    %159 = tpu.matmul %156, %158, %cst_68 {dimension_numbers = #tpu.dot_dimension_numbers<[1], [0], [0], [1], [0, 0, 1, 1], [], []>} : vector<8x32xbf16>, vector<32x128xbf16>, vector<8x128xf32> -> vector<8x128xf32>
    %160 = vector.extract_strided_slice %159 {offsets = [0, 0], sizes = [8, 32], strides = [1, 1]} : vector<8x128xf32> to vector<8x32xf32>
    %161 = vector.extract_strided_slice %159 {offsets = [0, 32], sizes = [8, 32], strides = [1, 1]} : vector<8x128xf32> to vector<8x32xf32>
    %cst_69 = arith.constant 0.176776692 : f32
    %162 = vector.broadcast %cst_69 : f32 to vector<8x32xf32>
    %163 = arith.mulf %161, %162 : vector<8x32xf32>
    %164 = vector.extract_strided_slice %159 {offsets = [0, 64], sizes = [8, 32], strides = [1, 1]} : vector<8x128xf32> to vector<8x32xf32>
    %165 = vector.extract_strided_slice %159 {offsets = [0, 96], sizes = [8, 32], strides = [1, 1]} : vector<8x128xf32> to vector<8x32xf32>
    %c1_70 = arith.constant 1 : index
    %c0_71 = arith.constant 0 : index
    %c0_72 = arith.constant 0 : index
    %166 = vector.load %arg9[%c1_70, %c0_71, %c0_72] : memref<3x1x32xf32, #tpu.memory_space<vmem>>, vector<1x1x32xf32>
    %167 = vector.shape_cast %166 : vector<1x1x32xf32> to vector<1x32xf32>
    %168 = vector.broadcast %167 : vector<1x32xf32> to vector<8x32xf32>
    %169 = arith.addf %165, %168 : vector<8x32xf32>
    %170 = arith.negf %169 : vector<8x32xf32>
    %171 = math.exp %170 : vector<8x32xf32>
    %cst_73 = arith.constant 1.000000e+00 : f32
    %172 = vector.broadcast %cst_73 : f32 to vector<8x32xf32>
    %173 = arith.addf %172, %171 : vector<8x32xf32>
    %174 = arith.divf %172, %173 : vector<8x32xf32>
    %c1_74 = arith.constant 1 : index
    %c0_75 = arith.constant 0 : index
    %c0_76 = arith.constant 0 : index
    %175 = vector.load %arg10[%c1_74, %c0_75, %c0_76] : memref<3x32x2xf32, #tpu.memory_space<vmem>>, vector<1x32x2xf32>
    %176 = vector.shape_cast %175 : vector<1x32x2xf32> to vector<32x2xf32>
    %cst_77 = arith.constant dense<0.000000e+00> : vector<8x2xf32>
    %177 = tpu.matmul %155, %176, %cst_77 {dimension_numbers = #tpu.dot_dimension_numbers<[1], [0], [0], [1], [0, 0, 1, 1], [], []>} : vector<8x32xf32>, vector<32x2xf32>, vector<8x2xf32> -> vector<8x2xf32>
    %c1_78 = arith.constant 1 : index
    %c0_79 = arith.constant 0 : index
    %c0_80 = arith.constant 0 : index
    %178 = vector.load %arg11[%c1_78, %c0_79, %c0_80] : memref<3x1x2xf32, #tpu.memory_space<vmem>>, vector<1x1x2xf32>
    %179 = vector.shape_cast %178 : vector<1x1x2xf32> to vector<1x2xf32>
    %180 = vector.broadcast %179 : vector<1x2xf32> to vector<8x2xf32>
    %181 = arith.addf %177, %180 : vector<8x2xf32>
    %182 = vector.extract_strided_slice %181 {offsets = [0, 0], sizes = [8, 1], strides = [1, 1]} : vector<8x2xf32> to vector<8x1xf32>
    %183 = vector.extract_strided_slice %181 {offsets = [0, 1], sizes = [8, 1], strides = [1, 1]} : vector<8x2xf32> to vector<8x1xf32>
    %cst_81 = arith.constant 0.000000e+00 : f32
    %184 = vector.broadcast %cst_81 : f32 to vector<8x1xf32>
    %185 = arith.subf %184, %183 : vector<8x1xf32>
    %cst_82 = arith.constant 0.000000e+00 : f32
    %186 = vector.broadcast %cst_82 : f32 to vector<8x1xf32>
    %187 = arith.maximumf %185, %186 : vector<8x1xf32>
    %188 = vector.broadcast %cst_82 : f32 to vector<8x1xf32>
    %189 = arith.subf %185, %188 : vector<8x1xf32>
    %190 = arith.cmpf one, %189, %189 : vector<8x1xf32>
    %191 = vector.broadcast %cst_82 : f32 to vector<8x1xf32>
    %192 = arith.addf %185, %191 : vector<8x1xf32>
    %193 = math.absf %189 : vector<8x1xf32>
    %cst_83 = arith.constant 0.000000e+00 : f32
    %194 = vector.broadcast %cst_83 : f32 to vector<8x1xf32>
    %195 = arith.subf %194, %193 : vector<8x1xf32>
    %196 = math.exp %195 : vector<8x1xf32>
    %197 = math.log1p %196 : vector<8x1xf32>
    %198 = arith.addf %187, %197 : vector<8x1xf32>
    %199 = arith.select %190, %192, %198 : vector<8x1xi1>, vector<8x1xf32>
    %cst_84 = arith.constant 0.000000e+00 : f32
    %200 = vector.broadcast %cst_84 : f32 to vector<8x1xf32>
    %201 = arith.subf %200, %199 : vector<8x1xf32>
    %cst_85 = arith.constant dense<0.000000e+00> : vector<8x1xf32>
    %202 = tpu.matmul %21, %201, %cst_85 {dimension_numbers = #tpu.dot_dimension_numbers<[1], [0], [0], [1], [0, 0, 1, 1], [], []>} : vector<8x8xf32>, vector<8x1xf32>, vector<8x1xf32> -> vector<8x1xf32>
    %203 = tpu.transpose %202, [1, 0] : vector<8x1xf32> -> vector<1x8xf32>
    %204 = vector.broadcast %202 : vector<8x1xf32> to vector<8x8xf32>
    %205 = vector.broadcast %203 : vector<1x8xf32> to vector<8x8xf32>
    %206 = arith.subf %204, %205 : vector<8x8xf32>
    %207 = tpu.transpose %182, [1, 0] : vector<8x1xf32> -> vector<1x8xf32>
    %208 = vector.broadcast %207 : vector<1x8xf32> to vector<8x8xf32>
    %209 = arith.addf %206, %208 : vector<8x8xf32>
    %cst_86 = arith.constant 0xFF800000 : f32
    %210 = vector.broadcast %cst_86 : f32 to vector<8x8xf32>
    %211 = arith.select %23, %209, %210 : vector<8x8xi1>, vector<8x8xf32>
    %cst_87 = arith.constant dense<0xFF800000> : vector<8xf32>
    %212 = vector.multi_reduction <maximumf>, %211, %cst_87 [1] : vector<8x8xf32> to vector<8xf32>
    %213 = vector.shape_cast %212 : vector<8xf32> to vector<8x1xf32>
    %214 = vector.broadcast %213 : vector<8x1xf32> to vector<8x8xf32>
    %215 = arith.subf %211, %214 : vector<8x8xf32>
    %216 = math.exp %215 : vector<8x8xf32>
    %cst_88 = arith.constant dense<0.000000e+00> : vector<8x8xf32>
    %217 = tpu.matmul %160, %163, %cst_88 {dimension_numbers = #tpu.dot_dimension_numbers<[1], [1], [0], [0], [0, 0, 1, 0], [], []>} : vector<8x32xf32>, vector<8x32xf32>, vector<8x8xf32> -> vector<8x8xf32>
    %218 = arith.mulf %217, %216 : vector<8x8xf32>
    %cst_89 = arith.constant dense<0.000000e+00> : vector<8xf32>
    %219 = vector.multi_reduction <add>, %218, %cst_89 [1] : vector<8x8xf32> to vector<8xf32>
    %220 = vector.shape_cast %219 : vector<8xf32> to vector<8x1xf32>
    %221 = math.absf %220 : vector<8x1xf32>
    %cst_90 = arith.constant 0.000000e+00 : f32
    %222 = vector.broadcast %cst_90 : f32 to vector<8x1xf32>
    %223 = arith.subf %222, %213 : vector<8x1xf32>
    %224 = math.exp %223 : vector<8x1xf32>
    %225 = arith.maximumf %221, %224 : vector<8x1xf32>
    %226 = tpu.reciprocal %225 {approx = true} : vector<8x1xf32> -> vector<8x1xf32>
    %227 = vector.broadcast %226 : vector<8x1xf32> to vector<8x8xf32>
    %228 = arith.mulf %218, %227 : vector<8x8xf32>
    %cst_91 = arith.constant dense<0.000000e+00> : vector<8x32xf32>
    %229 = tpu.matmul %228, %164, %cst_91 {dimension_numbers = #tpu.dot_dimension_numbers<[1], [0], [0], [1], [0, 0, 1, 1], [], []>} : vector<8x8xf32>, vector<8x32xf32>, vector<8x32xf32> -> vector<8x32xf32>
    %230 = arith.mulf %174, %229 : vector<8x32xf32>
    %231 = arith.truncf %230 : vector<8x32xf32> to vector<8x32xbf16>
    %c1_92 = arith.constant 1 : index
    %c0_93 = arith.constant 0 : index
    %c0_94 = arith.constant 0 : index
    %232 = vector.load %arg12[%c1_92, %c0_93, %c0_94] : memref<3x32x32xbf16, #tpu.memory_space<vmem>>, vector<1x32x32xbf16>
    %233 = vector.shape_cast %232 : vector<1x32x32xbf16> to vector<32x32xbf16>
    %cst_95 = arith.constant dense<0.000000e+00> : vector<8x32xf32>
    %234 = tpu.matmul %231, %233, %cst_95 {dimension_numbers = #tpu.dot_dimension_numbers<[1], [0], [0], [1], [0, 0, 1, 1], [], []>} : vector<8x32xbf16>, vector<32x32xbf16>, vector<8x32xf32> -> vector<8x32xf32>
    %235 = arith.addf %129, %234 : vector<8x32xf32>
    %cst_96 = arith.constant dense<0.000000e+00> : vector<8xf32>
    %236 = vector.multi_reduction <add>, %235, %cst_96 [1] : vector<8x32xf32> to vector<8xf32>
    %237 = vector.shape_cast %236 : vector<8xf32> to vector<8x1xf32>
    %cst_97 = arith.constant 3.200000e+01 : f32
    %238 = vector.broadcast %cst_97 : f32 to vector<8x1xf32>
    %239 = arith.divf %237, %238 : vector<8x1xf32>
    %240 = vector.broadcast %239 : vector<8x1xf32> to vector<8x32xf32>
    %241 = arith.subf %235, %240 : vector<8x32xf32>
    %242 = arith.mulf %241, %241 : vector<8x32xf32>
    %cst_98 = arith.constant dense<0.000000e+00> : vector<8xf32>
    %243 = vector.multi_reduction <add>, %242, %cst_98 [1] : vector<8x32xf32> to vector<8xf32>
    %244 = vector.shape_cast %243 : vector<8xf32> to vector<8x1xf32>
    %cst_99 = arith.constant 3.200000e+01 : f32
    %245 = vector.broadcast %cst_99 : f32 to vector<8x1xf32>
    %246 = arith.divf %244, %245 : vector<8x1xf32>
    %247 = vector.broadcast %239 : vector<8x1xf32> to vector<8x32xf32>
    %248 = arith.subf %235, %247 : vector<8x32xf32>
    %cst_100 = arith.constant 9.99999974E-6 : f32
    %249 = vector.broadcast %cst_100 : f32 to vector<8x1xf32>
    %250 = arith.addf %246, %249 : vector<8x1xf32>
    %251 = math.rsqrt %250 : vector<8x1xf32>
    %252 = vector.broadcast %251 : vector<8x1xf32> to vector<8x32xf32>
    %253 = arith.mulf %248, %252 : vector<8x32xf32>
    %c2 = arith.constant 2 : index
    %c0_101 = arith.constant 0 : index
    %c0_102 = arith.constant 0 : index
    %254 = vector.load %arg6[%c2, %c0_101, %c0_102] : memref<3x1x32xf32, #tpu.memory_space<vmem>>, vector<1x1x32xf32>
    %255 = vector.shape_cast %254 : vector<1x1x32xf32> to vector<1x32xf32>
    %256 = vector.broadcast %255 : vector<1x32xf32> to vector<8x32xf32>
    %257 = arith.mulf %253, %256 : vector<8x32xf32>
    %c2_103 = arith.constant 2 : index
    %c0_104 = arith.constant 0 : index
    %c0_105 = arith.constant 0 : index
    %258 = vector.load %arg7[%c2_103, %c0_104, %c0_105] : memref<3x1x32xf32, #tpu.memory_space<vmem>>, vector<1x1x32xf32>
    %259 = vector.shape_cast %258 : vector<1x1x32xf32> to vector<1x32xf32>
    %260 = vector.broadcast %259 : vector<1x32xf32> to vector<8x32xf32>
    %261 = arith.addf %257, %260 : vector<8x32xf32>
    %262 = arith.truncf %261 : vector<8x32xf32> to vector<8x32xbf16>
    %c2_106 = arith.constant 2 : index
    %c0_107 = arith.constant 0 : index
    %c0_108 = arith.constant 0 : index
    %263 = vector.load %arg8[%c2_106, %c0_107, %c0_108] : memref<3x32x128xbf16, #tpu.memory_space<vmem>>, vector<1x32x128xbf16>
    %264 = vector.shape_cast %263 : vector<1x32x128xbf16> to vector<32x128xbf16>
    %cst_109 = arith.constant dense<0.000000e+00> : vector<8x128xf32>
    %265 = tpu.matmul %262, %264, %cst_109 {dimension_numbers = #tpu.dot_dimension_numbers<[1], [0], [0], [1], [0, 0, 1, 1], [], []>} : vector<8x32xbf16>, vector<32x128xbf16>, vector<8x128xf32> -> vector<8x128xf32>
    %266 = vector.extract_strided_slice %265 {offsets = [0, 0], sizes = [8, 32], strides = [1, 1]} : vector<8x128xf32> to vector<8x32xf32>
    %267 = vector.extract_strided_slice %265 {offsets = [0, 32], sizes = [8, 32], strides = [1, 1]} : vector<8x128xf32> to vector<8x32xf32>
    %cst_110 = arith.constant 0.176776692 : f32
    %268 = vector.broadcast %cst_110 : f32 to vector<8x32xf32>
    %269 = arith.mulf %267, %268 : vector<8x32xf32>
    %270 = vector.extract_strided_slice %265 {offsets = [0, 64], sizes = [8, 32], strides = [1, 1]} : vector<8x128xf32> to vector<8x32xf32>
    %271 = vector.extract_strided_slice %265 {offsets = [0, 96], sizes = [8, 32], strides = [1, 1]} : vector<8x128xf32> to vector<8x32xf32>
    %c2_111 = arith.constant 2 : index
    %c0_112 = arith.constant 0 : index
    %c0_113 = arith.constant 0 : index
    %272 = vector.load %arg9[%c2_111, %c0_112, %c0_113] : memref<3x1x32xf32, #tpu.memory_space<vmem>>, vector<1x1x32xf32>
    %273 = vector.shape_cast %272 : vector<1x1x32xf32> to vector<1x32xf32>
    %274 = vector.broadcast %273 : vector<1x32xf32> to vector<8x32xf32>
    %275 = arith.addf %271, %274 : vector<8x32xf32>
    %276 = arith.negf %275 : vector<8x32xf32>
    %277 = math.exp %276 : vector<8x32xf32>
    %cst_114 = arith.constant 1.000000e+00 : f32
    %278 = vector.broadcast %cst_114 : f32 to vector<8x32xf32>
    %279 = arith.addf %278, %277 : vector<8x32xf32>
    %280 = arith.divf %278, %279 : vector<8x32xf32>
    %c2_115 = arith.constant 2 : index
    %c0_116 = arith.constant 0 : index
    %c0_117 = arith.constant 0 : index
    %281 = vector.load %arg10[%c2_115, %c0_116, %c0_117] : memref<3x32x2xf32, #tpu.memory_space<vmem>>, vector<1x32x2xf32>
    %282 = vector.shape_cast %281 : vector<1x32x2xf32> to vector<32x2xf32>
    %cst_118 = arith.constant dense<0.000000e+00> : vector<8x2xf32>
    %283 = tpu.matmul %261, %282, %cst_118 {dimension_numbers = #tpu.dot_dimension_numbers<[1], [0], [0], [1], [0, 0, 1, 1], [], []>} : vector<8x32xf32>, vector<32x2xf32>, vector<8x2xf32> -> vector<8x2xf32>
    %c2_119 = arith.constant 2 : index
    %c0_120 = arith.constant 0 : index
    %c0_121 = arith.constant 0 : index
    %284 = vector.load %arg11[%c2_119, %c0_120, %c0_121] : memref<3x1x2xf32, #tpu.memory_space<vmem>>, vector<1x1x2xf32>
    %285 = vector.shape_cast %284 : vector<1x1x2xf32> to vector<1x2xf32>
    %286 = vector.broadcast %285 : vector<1x2xf32> to vector<8x2xf32>
    %287 = arith.addf %283, %286 : vector<8x2xf32>
    %288 = vector.extract_strided_slice %287 {offsets = [0, 0], sizes = [8, 1], strides = [1, 1]} : vector<8x2xf32> to vector<8x1xf32>
    %289 = vector.extract_strided_slice %287 {offsets = [0, 1], sizes = [8, 1], strides = [1, 1]} : vector<8x2xf32> to vector<8x1xf32>
    %cst_122 = arith.constant 0.000000e+00 : f32
    %290 = vector.broadcast %cst_122 : f32 to vector<8x1xf32>
    %291 = arith.subf %290, %289 : vector<8x1xf32>
    %cst_123 = arith.constant 0.000000e+00 : f32
    %292 = vector.broadcast %cst_123 : f32 to vector<8x1xf32>
    %293 = arith.maximumf %291, %292 : vector<8x1xf32>
    %294 = vector.broadcast %cst_123 : f32 to vector<8x1xf32>
    %295 = arith.subf %291, %294 : vector<8x1xf32>
    %296 = arith.cmpf one, %295, %295 : vector<8x1xf32>
    %297 = vector.broadcast %cst_123 : f32 to vector<8x1xf32>
    %298 = arith.addf %291, %297 : vector<8x1xf32>
    %299 = math.absf %295 : vector<8x1xf32>
    %cst_124 = arith.constant 0.000000e+00 : f32
    %300 = vector.broadcast %cst_124 : f32 to vector<8x1xf32>
    %301 = arith.subf %300, %299 : vector<8x1xf32>
    %302 = math.exp %301 : vector<8x1xf32>
    %303 = math.log1p %302 : vector<8x1xf32>
    %304 = arith.addf %293, %303 : vector<8x1xf32>
    %305 = arith.select %296, %298, %304 : vector<8x1xi1>, vector<8x1xf32>
    %cst_125 = arith.constant 0.000000e+00 : f32
    %306 = vector.broadcast %cst_125 : f32 to vector<8x1xf32>
    %307 = arith.subf %306, %305 : vector<8x1xf32>
    %cst_126 = arith.constant dense<0.000000e+00> : vector<8x1xf32>
    %308 = tpu.matmul %21, %307, %cst_126 {dimension_numbers = #tpu.dot_dimension_numbers<[1], [0], [0], [1], [0, 0, 1, 1], [], []>} : vector<8x8xf32>, vector<8x1xf32>, vector<8x1xf32> -> vector<8x1xf32>
    %309 = tpu.transpose %308, [1, 0] : vector<8x1xf32> -> vector<1x8xf32>
    %310 = vector.broadcast %308 : vector<8x1xf32> to vector<8x8xf32>
    %311 = vector.broadcast %309 : vector<1x8xf32> to vector<8x8xf32>
    %312 = arith.subf %310, %311 : vector<8x8xf32>
    %313 = tpu.transpose %288, [1, 0] : vector<8x1xf32> -> vector<1x8xf32>
    %314 = vector.broadcast %313 : vector<1x8xf32> to vector<8x8xf32>
    %315 = arith.addf %312, %314 : vector<8x8xf32>
    %cst_127 = arith.constant 0xFF800000 : f32
    %316 = vector.broadcast %cst_127 : f32 to vector<8x8xf32>
    %317 = arith.select %23, %315, %316 : vector<8x8xi1>, vector<8x8xf32>
    %cst_128 = arith.constant dense<0xFF800000> : vector<8xf32>
    %318 = vector.multi_reduction <maximumf>, %317, %cst_128 [1] : vector<8x8xf32> to vector<8xf32>
    %319 = vector.shape_cast %318 : vector<8xf32> to vector<8x1xf32>
    %320 = vector.broadcast %319 : vector<8x1xf32> to vector<8x8xf32>
    %321 = arith.subf %317, %320 : vector<8x8xf32>
    %322 = math.exp %321 : vector<8x8xf32>
    %cst_129 = arith.constant dense<0.000000e+00> : vector<8x8xf32>
    %323 = tpu.matmul %266, %269, %cst_129 {dimension_numbers = #tpu.dot_dimension_numbers<[1], [1], [0], [0], [0, 0, 1, 0], [], []>} : vector<8x32xf32>, vector<8x32xf32>, vector<8x8xf32> -> vector<8x8xf32>
    %324 = arith.mulf %323, %322 : vector<8x8xf32>
    %cst_130 = arith.constant dense<0.000000e+00> : vector<8xf32>
    %325 = vector.multi_reduction <add>, %324, %cst_130 [1] : vector<8x8xf32> to vector<8xf32>
    %326 = vector.shape_cast %325 : vector<8xf32> to vector<8x1xf32>
    %327 = math.absf %326 : vector<8x1xf32>
    %cst_131 = arith.constant 0.000000e+00 : f32
    %328 = vector.broadcast %cst_131 : f32 to vector<8x1xf32>
    %329 = arith.subf %328, %319 : vector<8x1xf32>
    %330 = math.exp %329 : vector<8x1xf32>
    %331 = arith.maximumf %327, %330 : vector<8x1xf32>
    %332 = tpu.reciprocal %331 {approx = true} : vector<8x1xf32> -> vector<8x1xf32>
    %333 = vector.broadcast %332 : vector<8x1xf32> to vector<8x8xf32>
    %334 = arith.mulf %324, %333 : vector<8x8xf32>
    %cst_132 = arith.constant dense<0.000000e+00> : vector<8x32xf32>
    %335 = tpu.matmul %334, %270, %cst_132 {dimension_numbers = #tpu.dot_dimension_numbers<[1], [0], [0], [1], [0, 0, 1, 1], [], []>} : vector<8x8xf32>, vector<8x32xf32>, vector<8x32xf32> -> vector<8x32xf32>
    %336 = arith.mulf %280, %335 : vector<8x32xf32>
    %337 = arith.truncf %336 : vector<8x32xf32> to vector<8x32xbf16>
    %c2_133 = arith.constant 2 : index
    %c0_134 = arith.constant 0 : index
    %c0_135 = arith.constant 0 : index
    %338 = vector.load %arg12[%c2_133, %c0_134, %c0_135] : memref<3x32x32xbf16, #tpu.memory_space<vmem>>, vector<1x32x32xbf16>
    %339 = vector.shape_cast %338 : vector<1x32x32xbf16> to vector<32x32xbf16>
    %cst_136 = arith.constant dense<0.000000e+00> : vector<8x32xf32>
    %340 = tpu.matmul %337, %339, %cst_136 {dimension_numbers = #tpu.dot_dimension_numbers<[1], [0], [0], [1], [0, 0, 1, 1], [], []>} : vector<8x32xbf16>, vector<32x32xbf16>, vector<8x32xf32> -> vector<8x32xf32>
    %341 = arith.addf %235, %340 : vector<8x32xf32>
    %cst_137 = arith.constant dense<0.000000e+00> : vector<8xf32>
    %342 = vector.multi_reduction <add>, %341, %cst_137 [1] : vector<8x32xf32> to vector<8xf32>
    %343 = vector.shape_cast %342 : vector<8xf32> to vector<8x1xf32>
    %cst_138 = arith.constant 3.200000e+01 : f32
    %344 = vector.broadcast %cst_138 : f32 to vector<8x1xf32>
    %345 = arith.divf %343, %344 : vector<8x1xf32>
    %346 = vector.broadcast %345 : vector<8x1xf32> to vector<8x32xf32>
    %347 = arith.subf %341, %346 : vector<8x32xf32>
    %348 = arith.mulf %347, %347 : vector<8x32xf32>
    %cst_139 = arith.constant dense<0.000000e+00> : vector<8xf32>
    %349 = vector.multi_reduction <add>, %348, %cst_139 [1] : vector<8x32xf32> to vector<8xf32>
    %350 = vector.shape_cast %349 : vector<8xf32> to vector<8x1xf32>
    %cst_140 = arith.constant 3.200000e+01 : f32
    %351 = vector.broadcast %cst_140 : f32 to vector<8x1xf32>
    %352 = arith.divf %350, %351 : vector<8x1xf32>
    %353 = vector.broadcast %345 : vector<8x1xf32> to vector<8x32xf32>
    %354 = arith.subf %341, %353 : vector<8x32xf32>
    %cst_141 = arith.constant 9.99999974E-6 : f32
    %355 = vector.broadcast %cst_141 : f32 to vector<8x1xf32>
    %356 = arith.addf %352, %355 : vector<8x1xf32>
    %357 = math.rsqrt %356 : vector<8x1xf32>
    %358 = vector.broadcast %357 : vector<8x1xf32> to vector<8x32xf32>
    %359 = arith.mulf %354, %358 : vector<8x32xf32>
    %c0_142 = arith.constant 0 : index
    %c0_143 = arith.constant 0 : index
    %360 = vector.load %arg13[%c0_142, %c0_143] : memref<1x32xf32, #tpu.memory_space<vmem>>, vector<1x32xf32>
    %361 = vector.broadcast %360 : vector<1x32xf32> to vector<8x32xf32>
    %362 = arith.mulf %359, %361 : vector<8x32xf32>
    %c0_144 = arith.constant 0 : index
    %c0_145 = arith.constant 0 : index
    %363 = vector.load %arg14[%c0_144, %c0_145] : memref<1x32xf32, #tpu.memory_space<vmem>>, vector<1x32xf32>
    %364 = vector.broadcast %363 : vector<1x32xf32> to vector<8x32xf32>
    %365 = arith.addf %362, %364 : vector<8x32xf32>
    %c0_146 = arith.constant 0 : index
    %c0_147 = arith.constant 0 : index
    %366 = vector.load %arg15[%c0_146, %c0_147] : memref<32x16xbf16, #tpu.memory_space<vmem>>, vector<32x16xbf16>
    %367 = arith.truncf %365 : vector<8x32xf32> to vector<8x32xbf16>
    %cst_148 = arith.constant dense<0.000000e+00> : vector<16x8xf32>
    %368 = tpu.matmul %366, %367, %cst_148 {dimension_numbers = #tpu.dot_dimension_numbers<[0], [1], [1], [0], [0, 1, 1, 0], [], []>} : vector<32x16xbf16>, vector<8x32xbf16>, vector<16x8xf32> -> vector<16x8xf32>
    %c0_149 = arith.constant 0 : index
    %c0_150 = arith.constant 0 : index
    %369 = vector.load %arg16[%c0_149, %c0_150] : memref<16x1xf32, #tpu.memory_space<vmem>>, vector<16x1xf32>
    %370 = vector.broadcast %369 : vector<16x1xf32> to vector<16x8xf32>
    %371 = arith.addf %368, %370 : vector<16x8xf32>
    %372 = vector.extract_strided_slice %371 {offsets = [0, 0], sizes = [16, 3], strides = [1, 1]} : vector<16x8xf32> to vector<16x3xf32>
    %c0_151 = arith.constant 0 : index
    %c0_152 = arith.constant 0 : index
    %c0_153 = arith.constant 0 : index
    %373 = vector.load %arg17[%c0_151, %c0_152, %c0_153] : memref<1x16x3xf32, #tpu.memory_space<vmem>>, vector<1x16x3xf32>
    %374 = vector.shape_cast %373 : vector<1x16x3xf32> to vector<16x3xf32>
    %375 = vector.shape_cast %372 : vector<16x3xf32> to vector<1x16x3xf32>
    tpu.vector_store %arg17[%c0_151, %c0_152, %c0_153], %375 {strides = array<i32>} : memref<1x16x3xf32, #tpu.memory_space<vmem>>, vector<1x16x3xf32>,
    return
  }
  func.func @transform_0(%arg0: i32) -> (i32, i32, i32) {
    %c0_i32 = arith.constant 0 : i32
    %c0_i32_0 = arith.constant 0 : i32
    %c0_i32_1 = arith.constant 0 : i32
    return %arg0, %c0_i32, %c0_i32_0 : i32, i32, i32
  }
  func.func @transform_1(%arg0: i32) -> (i32, i32) {
    %c0_i32 = arith.constant 0 : i32
    %c0_i32_0 = arith.constant 0 : i32
    %c0_i32_1 = arith.constant 0 : i32
    return %c0_i32, %c0_i32_0 : i32, i32
  }
  func.func @transform_2(%arg0: i32) -> (i32, i32) {
    %c0_i32 = arith.constant 0 : i32
    %c0_i32_0 = arith.constant 0 : i32
    %c0_i32_1 = arith.constant 0 : i32
    return %c0_i32, %c0_i32_0 : i32, i32
  }
  func.func @transform_3(%arg0: i32) -> (i32, i32) {
    %c0_i32 = arith.constant 0 : i32
    %c0_i32_0 = arith.constant 0 : i32
    %c0_i32_1 = arith.constant 0 : i32
    return %c0_i32, %c0_i32_0 : i32, i32
  }
  func.func @transform_4(%arg0: i32) -> (i32, i32) {
    %c0_i32 = arith.constant 0 : i32
    %c0_i32_0 = arith.constant 0 : i32
    %c0_i32_1 = arith.constant 0 : i32
    return %c0_i32, %c0_i32_0 : i32, i32
  }
  func.func @transform_5(%arg0: i32) -> (i32, i32, i32) {
    %c0_i32 = arith.constant 0 : i32
    %c0_i32_0 = arith.constant 0 : i32
    %c0_i32_1 = arith.constant 0 : i32
    %c0_i32_2 = arith.constant 0 : i32
    return %c0_i32, %c0_i32_0, %c0_i32_1 : i32, i32, i32
  }
  func.func @transform_6(%arg0: i32) -> (i32, i32, i32) {
    %c0_i32 = arith.constant 0 : i32
    %c0_i32_0 = arith.constant 0 : i32
    %c0_i32_1 = arith.constant 0 : i32
    %c0_i32_2 = arith.constant 0 : i32
    return %c0_i32, %c0_i32_0, %c0_i32_1 : i32, i32, i32
  }
  func.func @transform_7(%arg0: i32) -> (i32, i32, i32) {
    %c0_i32 = arith.constant 0 : i32
    %c0_i32_0 = arith.constant 0 : i32
    %c0_i32_1 = arith.constant 0 : i32
    %c0_i32_2 = arith.constant 0 : i32
    return %c0_i32, %c0_i32_0, %c0_i32_1 : i32, i32, i32
  }
  func.func @transform_8(%arg0: i32) -> (i32, i32, i32) {
    %c0_i32 = arith.constant 0 : i32
    %c0_i32_0 = arith.constant 0 : i32
    %c0_i32_1 = arith.constant 0 : i32
    %c0_i32_2 = arith.constant 0 : i32
    return %c0_i32, %c0_i32_0, %c0_i32_1 : i32, i32, i32
  }
  func.func @transform_9(%arg0: i32) -> (i32, i32, i32) {
    %c0_i32 = arith.constant 0 : i32
    %c0_i32_0 = arith.constant 0 : i32
    %c0_i32_1 = arith.constant 0 : i32
    %c0_i32_2 = arith.constant 0 : i32
    return %c0_i32, %c0_i32_0, %c0_i32_1 : i32, i32, i32
  }
  func.func @transform_10(%arg0: i32) -> (i32, i32, i32) {
    %c0_i32 = arith.constant 0 : i32
    %c0_i32_0 = arith.constant 0 : i32
    %c0_i32_1 = arith.constant 0 : i32
    %c0_i32_2 = arith.constant 0 : i32
    return %c0_i32, %c0_i32_0, %c0_i32_1 : i32, i32, i32
  }
  func.func @transform_11(%arg0: i32) -> (i32, i32, i32) {
    %c0_i32 = arith.constant 0 : i32
    %c0_i32_0 = arith.constant 0 : i32
    %c0_i32_1 = arith.constant 0 : i32
    %c0_i32_2 = arith.constant 0 : i32
    return %c0_i32, %c0_i32_0, %c0_i32_1 : i32, i32, i32
  }
  func.func @transform_12(%arg0: i32) -> (i32, i32) {
    %c0_i32 = arith.constant 0 : i32
    %c0_i32_0 = arith.constant 0 : i32
    %c0_i32_1 = arith.constant 0 : i32
    return %c0_i32, %c0_i32_0 : i32, i32
  }
  func.func @transform_13(%arg0: i32) -> (i32, i32) {
    %c0_i32 = arith.constant 0 : i32
    %c0_i32_0 = arith.constant 0 : i32
    %c0_i32_1 = arith.constant 0 : i32
    return %c0_i32, %c0_i32_0 : i32, i32
  }
  func.func @transform_14(%arg0: i32) -> (i32, i32) {
    %c0_i32 = arith.constant 0 : i32
    %c0_i32_0 = arith.constant 0 : i32
    %c0_i32_1 = arith.constant 0 : i32
    return %c0_i32, %c0_i32_0 : i32, i32
  }
  func.func @transform_15(%arg0: i32) -> (i32, i32) {
    %c0_i32 = arith.constant 0 : i32
    %c0_i32_0 = arith.constant 0 : i32
    %c0_i32_1 = arith.constant 0 : i32
    return %c0_i32, %c0_i32_0 : i32, i32
  }
  func.func @transform_16(%arg0: i32) -> (i32, i32, i32) {
    %c0_i32 = arith.constant 0 : i32
    %c0_i32_0 = arith.constant 0 : i32
    %c0_i32_1 = arith.constant 0 : i32
    return %arg0, %c0_i32, %c0_i32_0 : i32, i32, i32
  }
}

</mosaic_0001>

<bundles_post_ra>
// kernel: model_forward.1
= control target key start
LH: loop header
LB: loop body
LE: loop exit
PB: predicated region body
PF: predicated region fallthrough
CT: control target
= control target key end

     0   :  { %s4330_s0 = inlined_call_operand.hbm [shape: f32[2,8,32], index: 0, kind: input, shape index: {}]   ;;  %s4331_s1 = inlined_call_operand.hbm [shape: f32[56,32], index: 1, kind: input, shape index: {}]   ;;  %s4332_s2 = inlined_call_operand.hbm [shape: f32[8,8], index: 2, kind: input, shape index: {}]   ;;  %s4333_s3 = inlined_call_operand.hbm [shape: bf16[64,32], index: 3, kind: input, shape index: {}]   ;;  %s4334_s4 = inlined_call_operand.hbm [shape: f32[1,32], index: 4, kind: input, shape index: {}]   ;;  %s4335_s5 = inlined_call_operand.vmem [shape: f32[3,1,32], index: 5, kind: input, shape index: {}]   ;;  %s4336_s6 = inlined_call_operand.vmem [shape: f32[3,1,32], index: 6, kind: input, shape index: {}, may-alias: {6,8}]   ;;  %s4337_s7 = inlined_call_operand.hbm [shape: bf16[3,32,128], index: 7, kind: input, shape index: {}]   ;;  %s4338_s8 = inlined_call_operand.vmem [shape: f32[3,1,32], index: 8, kind: input, shape index: {}, may-alias: {6,8}]   ;;  %s4339_s9 = inlined_call_operand.hbm [shape: f32[3,32,2], index: 9, kind: input, shape index: {}]   ;;  %s4340_s10 = inlined_call_operand.hbm [shape: f32[3,1,2], index: 10, kind: input, shape index: {}]   ;;  %s4341_s11 = inlined_call_operand.hbm [shape: bf16[3,32,32], index: 11, kind: input, shape index: {}]   ;;  %s4342_s12 = inlined_call_operand.vmem [shape: f32[1,32], index: 12, kind: input, shape index: {}]   ;;  %s4343_s13 = inlined_call_operand.vmem [shape: f32[1,32], index: 13, kind: input, shape index: {}]   ;;  %s4344_s14 = inlined_call_operand.vmem [shape: bf16[32,16], index: 14, kind: input, shape index: {}]   ;;  %s4345_s15 = inlined_call_operand.vmem [shape: f32[16,1], index: 15, kind: input, shape index: {}]   ;;  %s4346_s16 = inlined_call_operand.vmem [shape: f32[2,16,3], index: 16, kind: output, shape index: {}]  }
   0x1   :  { %4355 = sst [smem:[#allocation21_spill]] %s4330_s0 }
   0x2   :  { %4356 = sst [smem:[#allocation22_spill]] %s4331_s1 }
   0x3   :  { %4357 = sst [smem:[#allocation23_spill]] %s4332_s2 }
   0x4   :  { %4358 = sst [smem:[#allocation24_spill]] %s4333_s3 }
   0x5   :  { %4359 = sst [smem:[#allocation25_spill]] %s4334_s4 }
   0x6   :  { %4360 = sst [smem:[#allocation26_spill]] %s4342_s12 }
   0x7   :  { %4361 = sst [smem:[#allocation27_spill]] %s4343_s13 }
   0x8   :  { %4362 = sst [smem:[#allocation28_spill]] %s4346_s16 }
   0x9   :  { %21 = vsyncpa [#allocation3], 0 }
   0xa   :  { %23 = vsyncpa [#allocation3 + $0x1], 0 }
   0xb   :  { %24 = vsyncpa [#allocation5], 0 }
   0xc   :  { %25 = vsyncpa [#allocation8], 0 }
   0xd   :  { %26 = vsyncpa [#allocation11], 0 }
   0xe   :  { %27 = vsyncpa [#allocation14], 0  ;;  %s3867_s21 = smov 0   ;;  %s3869_s22 = smov 0  }
   0xf   :  { %s3871_s23 = smov 0   ;;  %s3873_s24 = smov 0  }
  0x10 LB: > { %s3758_s25 = smov [#allocation4]   ;;  %s3888_s27 = sadd.s32 4294967295, %s3756_s24   ;;  %s3756_s24 = sphi %s3873_s24, %s4394_s24   ;;  %s3752_s23 = sphi %s3871_s23, %s4393_s23   ;;  %s3748_s22 = sphi %s3869_s22, %s4392_s22   ;;  %s3744_s21 = sphi %s3867_s21, %s4391_s21  }
  0x11   : > { %s417_s26 = sshll.u32 %s3758_s25, 4  ;;  %p2943_p0 = scmp.ge.s32.totalorder %s3756_s24, 1  ;;  %s418_s26 = int_to_ptr.vmem [resolvable:$true] %s417_s26 }
  0x12   : > { %p4352_p1 = scmp.eq.s32.totalorder %s3888_s27, 0  ;;  %p405_p2 = scmp.lt.s32.totalorder %s3756_s24, 3 }
  0x13   : > { %s3759_s29 = smov [#allocation7]   ;;  %s3760_s17 = smov [#allocation10]  }
  0x14   : > { %p3893_p3 = pnand %p2943_p0, %p405_p2  ;;  %s441_s30 = sshll.u32 %s3759_s29, 4  ;;  %s3905_s30 = int_to_ptr.vmem [resolvable:$true] %s441_s30 }
  0x15   : > { %s3907_s18 = sshll.u32 %s3760_s17, 4  ;;  %s3481_s20 = scalar_lea.vmem %s418_s26, 896  ;;  %s472_s18 = int_to_ptr.vmem [resolvable:$true] %s3907_s18 }
  0x16   : > { %s4363_s28 = scalar_select %p3893_p3, 1, 0 }
  0x17   : > { %p3297_p4 = pneg %p3893_p3  ;;  %p3482_p7 = scmp.ne.s32.totalorder %s418_s26, %s3481_s20 }
  0x18   : > { %p3489_p10 = scmp.lt.s32.totalorder %s418_s26, %s418_s26  ;;  %p3490_p11 = scmp.lt.s32.totalorder %s3481_s20, %s3481_s20 }
  0x19   : > { %p3901_p5 = pnand %p3297_p4, %p4352_p1 }
  0x1a   : > { %p3491_p12 = por %p3490_p11, %p3489_p10 }
  0x1b   : > { %p3911_p6 = pneg %p3901_p5 }
  0x1d   : > { %p3484_p8 = pnand %p3482_p7, %p3911_p6 }
  0x1f   : > { %p3485_p9 = pneg %p3484_p8 }
  0x21   : > { %p3492_p13 = pnand %p3491_p12, %p3485_p9 }
  0x23   : > { %3495 = shalt.err (!%p3492_p13)
}
  0x24   : > { %s4348_s25 = smov 128   ;;  %s4349_s29 = smov 8  }
  0x25   : > { %s4366_s1 = sld [smem:[#allocation22_spill]]  ;;  %s3507_s13 = scalar_lea.vmem %s3905_s30, 512 }
  0x26   : > { %p3508_p0 = scmp.ne.s32.totalorder %s3905_s30, %s3507_s13  ;;  %p3515_p7 = scmp.lt.s32.totalorder %s3905_s30, %s3905_s30 }
  0x27   : > { %p3516_p8 = scmp.lt.s32.totalorder %s3507_s13, %s3507_s13 }
  0x28   : > { %p3510_p2 = pnand %p3508_p0, %p3911_p6 }
  0x29   : > { %p3517_p9 = por %p3516_p8, %p3515_p7 }
  0x2a   : > { %p3511_p4 = pneg %p3510_p2 }
  0x2b   : > { %3300 = dma.hbm_to_vmem [thread:$0]  (!%p3901_p5), %s4366_s1, 896, %s418_s26, [#allocation5], %s4348_s25, %s4348_s25, %s4349_s29  }
  0x2c   : > { %p3518_p10 = pnand %p3517_p9, %p3511_p4 }
  0x2e   : > { %3521 = shalt.err (!%p3518_p10)
}
  0x2f   : > { %s4350_s20 = smov 64   ;;  %s4351_s12 = smov 4  }
  0x30   : > { %s4367_s3 = sld [smem:[#allocation24_spill]]  ;;  %s3533_s17 = scalar_lea.vmem %s472_s18, 768 }
  0x31   : > { %p3534_p11 = scmp.ne.s32.totalorder %s472_s18, %s3533_s17  ;;  %p3541_p0 = scmp.lt.s32.totalorder %s472_s18, %s472_s18 }
  0x32   : > { %p3542_p2 = scmp.lt.s32.totalorder %s3533_s17, %s3533_s17 }
  0x33   : > { %p3536_p12 = pnand %p3534_p11, %p3911_p6 }
  0x34   : > { %p3543_p4 = por %p3542_p2, %p3541_p0 }
  0x35   : > { %p3537_p13 = pneg %p3536_p12 }
  0x36   : > { %3306 = dma.hbm_to_vmem [thread:$0]  (!%p3901_p5), %s4367_s3, 512, %s3905_s30, [#allocation8], %s4350_s20, %s4350_s20, %s4351_s12  }
  0x37   : > { %p3544_p7 = pnand %p3543_p4, %p3537_p13 }
  0x39   : > { %3547 = shalt.err (!%p3544_p7)
}
  0x3a   : > { %3312 = dma.hbm_to_vmem [thread:$0]  (!%p3901_p5), %s4337_s7, 768, %s472_s18, [#allocation11], %s4350_s20, %s4350_s20, %s4351_s12  }
  0x3b   : > { %s3765_s30 = smov [#allocation13]  }
  0x3c   : > { %s500_s16 = sshll.u32 %s3765_s30, 4  ;;  %s501_s16 = int_to_ptr.vmem [resolvable:$true] %s500_s16 }
  0x3d   : > { %s3559_s26 = scalar_lea.vmem %s501_s16, 48  ;;  %s3566_s17 = scalar_lea.vmem %s501_s16, 64 }
  0x3e   : > { %p3560_p8 = scmp.ne.s32.totalorder %s501_s16, %s3559_s26  ;;  %p3567_p11 = scmp.lt.s32.totalorder %s501_s16, %s501_s16 }
  0x3f   : > { %p3568_p12 = scmp.lt.s32.totalorder %s3566_s17, %s3559_s26 }
  0x40   : > { %p3562_p9 = pnand %p3560_p8, %p3911_p6 }
  0x41   : > { %p3569_p13 = por %p3568_p12, %p3567_p11 }
  0x42   : > { %p3563_p10 = pneg %p3562_p9 }
  0x44   : > { %p3570_p0 = pnand %p3569_p13, %p3563_p10 }
  0x46   : > { %3573 = shalt.err (!%p3570_p0)
}
  0x47   : > { %s3766_s29 = smov 16   ;;  %s3767_s25 = smov 1  }
  0x48   : > { %3318 = dma.hbm_to_vmem [thread:$0]  (!%p3901_p5), %s4340_s10, 48, %s501_s16, [#allocation14], %s3766_s29, %s3766_s29, %s3767_s25  }
  0x49   : > { %s3768_s30 = smov [#allocation6]   ;;  %s3769_s12 = smov [#allocation9]  }
  0x4a   : > { %s431_s20 = sshll.u32 %s3768_s30, 4  ;;  %s455_s1 = sshll.u32 %s3769_s12, 4  ;;  %s432_s20 = int_to_ptr.vmem [resolvable:$true] %s431_s20  ;;  %s456_s1 = int_to_ptr.vmem [resolvable:$true] %s455_s1 }
  0x4b   : > { %s3585_s3 = scalar_lea.vmem %s432_s20, 128  ;;  %p3593_p8 = scmp.lt.s32.totalorder %s432_s20, %s432_s20 }
  0x4c   : > { %p3586_p2 = scmp.ne.s32.totalorder %s432_s20, %s3585_s3  ;;  %p3594_p9 = scmp.lt.s32.totalorder %s3585_s3, %s3585_s3 }
  0x4e   : > { %p3588_p4 = pnand %p3586_p2, %p3911_p6  ;;  %p3595_p10 = por %p3594_p9, %p3593_p8 }
  0x50   : > { %p3589_p7 = pneg %p3588_p4 }
  0x52   : > { %p3596_p11 = pnand %p3595_p10, %p3589_p7 }
  0x54   : > { %3599 = shalt.err (!%p3596_p11)
}
  0x55   : > { %s4368_s2 = sld [smem:[#allocation23_spill]]  ;;  %s3611_s12 = scalar_lea.vmem %s456_s1, 16 }
  0x56   : > { %p3612_p12 = scmp.ne.s32.totalorder %s456_s1, %s3611_s12  ;;  %s3618_s16 = scalar_lea.vmem %s456_s1, 32 }
  0x57   : > { %p3619_p2 = scmp.lt.s32.totalorder %s456_s1, %s456_s1  ;;  %p3620_p4 = scmp.lt.s32.totalorder %s3618_s16, %s3611_s12 }
  0x58   : > { %p3614_p13 = pnand %p3612_p12, %p3911_p6 }
  0x59   : > { %p3621_p1 = por %p3620_p4, %p3619_p2 }
  0x5a   : > { %p3615_p0 = pneg %p3614_p13 }
  0x5b   : > { %3303 = dma.hbm_to_vmem [thread:$0]  (!%p3901_p5), %s4368_s2, 128, %s432_s20, [#allocation5]  }
  0x5c   : > { %p3622_p3 = pnand %p3621_p1, %p3615_p0 }
  0x5e   : > { %3625 = shalt.err (!%p3622_p3)
}
  0x5f   : > { %s4369_s4 = sld [smem:[#allocation25_spill]]  ;;  %s3770_s25 = smov [#allocation12]  }
  0x60   : > { %s487_s20 = sshll.u32 %s3770_s25, 4  ;;  %s3771_s18 = smov [#allocation15]   ;;  %s488_s20 = int_to_ptr.vmem [resolvable:$true] %s487_s20 }
  0x61   : > { %s513_s13 = sshll.u32 %s3771_s18, 4  ;;  %s3637_s30 = scalar_lea.vmem %s488_s20, 1536  ;;  %s514_s13 = int_to_ptr.vmem [resolvable:$true] %s513_s13 }
  0x62   : > { %p3638_p7 = scmp.ne.s32.totalorder %s488_s20, %s3637_s30  ;;  %p3645_p1 = scmp.lt.s32.totalorder %s488_s20, %s488_s20 }
  0x63   : > { %p3646_p3 = scmp.lt.s32.totalorder %s3637_s30, %s3637_s30 }
  0x64   : > { %p3640_p8 = pnand %p3638_p7, %p3911_p6 }
  0x65   : > { %3309 = dma.hbm_to_vmem [thread:$0]  (!%p3901_p5), %s4369_s4, 16, %s456_s1, [#allocation8]  }
  0x66   : > { %p3641_p9 = pneg %p3640_p8  ;;  %p3647_p10 = por %p3646_p3, %p3645_p1 }
  0x68   : > { %p3648_p11 = pnand %p3647_p10, %p3641_p9 }
  0x6a   : > { %3651 = shalt.err (!%p3648_p11)
}
  0x6b   : > { %s4370_s26 = smov 8   ;;  %s4371_s1 = smov 128  }
  0x6c   : > { %3315 = dma.hbm_to_vmem [thread:$0]  (!%p3901_p5), %s4339_s9, 1536, %s488_s20, [#allocation11], %s4371_s1, %s4371_s1, %s4370_s26  }
  0x6d   : > { %s3663_s16 = scalar_lea.vmem %s514_s13, 768  ;;  %p3671_p2 = scmp.lt.s32.totalorder %s514_s13, %s514_s13 }
  0x6e   : > { %p3664_p12 = scmp.ne.s32.totalorder %s514_s13, %s3663_s16  ;;  %p3672_p4 = scmp.lt.s32.totalorder %s3663_s16, %s3663_s16 }
  0x70   : > { %p3666_p13 = pnand %p3664_p12, %p3911_p6  ;;  %p3673_p7 = por %p3672_p4, %p3671_p2 }
  0x72   : > { %p3667_p0 = pneg %p3666_p13 }
  0x74   : > { %p3674_p8 = pnand %p3673_p7, %p3667_p0 }
  0x76   : > { %3677 = shalt.err (!%p3674_p8)
}
  0x77   : > { %s4372_s3 = smov 4   ;;  %s4373_s17 = smov 64  }
  0x78   : > { %3321 = dma.hbm_to_vmem [thread:$0]  (!%p3901_p5), %s4341_s11, 768, %s514_s13, [#allocation14], %s4373_s17, %s4373_s17, %s4372_s3  }
  0x79   : > { %s3993_s0 = sadd.s32 1, %s3756_s24   ;;  %s40_s19 = sadd.s32 1, %s3752_s23 }
  0x7a   : > { %s37_s20 = ssub.s32 %s3756_s24, %s3993_s0  ;;  %p47_p6 = scmp.ne.s32.totalorder %s3752_s23, %s3748_s22 }
  0x7b   : > { %p38_p9 = scmp.eq.s32.totalorder %s37_s20, 0  ;;  %p48_p1 = scmp.eq.s32.totalorder %s3756_s24, 0 }
  0x7c   : > { %p53_p3 = scmp.ne.s32.totalorder %s3748_s22, %s3744_s21  ;;  %p3334_p10 = scmp.lt.s32.totalorder %s3756_s24, 2 }
  0x7d   : > { %s4005_s30 = scalar_select %p38_p9, %s3752_s23, %s40_s19  }
  0x7e   : > { %p49_p11 = por %p48_p1, %p47_p6  ;;  %p4374_p12 = scmp.eq.s32.totalorder %s3888_s27, 0 }
  0x7f   : > { %s539_s1 = sand.u32 1, %s3752_s23   ;;  %s2954_s13 = sshll.u32 %s3756_s24, 7 }
  0x80   : > { %p4009_p13 = por %p4374_p12, %p53_p3  ;;  %s2953_s29 = sshll.u32 %s539_s1, 3 }
  0x81   : > { %s4376_s3 = sld [smem:[#allocation21_spill]]  ;;  %s543_s21 = scalar_lea.vmem [#allocation2], %s2953_s29 }
  0x82   : > { %s4375_s26 = scalar_select %p4009_p13, 1, 0 }
  0x83   : > { %s550_s25 = sshll.u32 %s543_s21, 4  ;;  %p4020_p5 = pnand %p3334_p10, %p49_p11  ;;  %s551_s25 = int_to_ptr.vmem [resolvable:$true] %s550_s25 }
  0x84   : > { %s540_s19 = scalar_lea.sflag [#allocation3], %s539_s1 }
  0x85   : > { %p3680_p2 = pneg %p4020_p5 }
  0x87   : > { %s4018_s17 = scalar_lea.hbm %s4376_s3, %s2954_s13  ;;  %s3683_s12 = scalar_lea.hbm %s4376_s3, 256 }
  0x88   : > { %s3678_s20 = scalar_lea.hbm %s4018_s17, 128  ;;  %p3684_p8 = scmp.lt.s32.totalorder %s4018_s17, %s4376_s3 }
  0x89   : > { %p3679_p0 = scmp.ne.s32.totalorder %s4018_s17, %s3678_s20  ;;  %p3685_p6 = scmp.lt.s32.totalorder %s3683_s12, %s3678_s20 }
  0x8b   : > { %p3681_p4 = pnand %p3680_p2, %p3679_p0  ;;  %p3686_p9 = por %p3685_p6, %p3684_p8 }
  0x8d   : > { %p3682_p7 = pneg %p3681_p4 }
  0x8f   : > { %p3687_p1 = pnand %p3686_p9, %p3682_p7 }
  0x91   : > { %3690 = shalt.err (!%p3687_p1)
}
  0x92   : > { %s3691_s21 = scalar_lea.vmem %s551_s25, 128  ;;  %s3772_s1 = smov [#allocation2]  }
  0x93   : > { %p3692_p3 = scmp.ne.s32.totalorder %s551_s25, %s3691_s21  ;;  %s3696_s2 = sshll.u32 %s3772_s1, 4  ;;  %s3697_s2 = int_to_ptr.vmem [resolvable:$false] %s3696_s2 }
  0x94   : > { %s3698_s4 = scalar_lea.vmem %s3697_s2, 256  ;;  %p3699_p12 = scmp.lt.s32.totalorder %s551_s25, %s3697_s2 }
  0x95   : > { %p3694_p10 = pnand %p3692_p3, %p3680_p2  ;;  %p3700_p0 = scmp.lt.s32.totalorder %s3698_s4, %s3691_s21 }
  0x97   : > { %p3695_p11 = pneg %p3694_p10  ;;  %p3701_p4 = por %p3700_p0, %p3699_p12 }
  0x99   : > { %p3702_p13 = pnand %p3701_p4, %p3695_p11 }
  0x9b   : > { %3705 = shalt.err (!%p3702_p13)
}
  0x9c   : > { %3325 = dma.hbm_to_vmem [thread:$0]  (!%p4020_p5), %s4018_s17, 128, %s551_s25, %s540_s19  }
  0x9d   : > { %p4378_p7 = scmp.ne.s32.totalorder %s4363_s28, 0 }
  0x9e   : > { %s561_s20 = sand.u32 (!%p4378_p7), 1, %s3748_s22   ;;  %p4379_p2 = scmp.ne.s32.totalorder (!%p4378_p7), %s4375_s26, 0 }
  0x9f   : > { %559 = sbr.rel (%p4378_p7) target bundleno = 7223 (0x1c37), region = 84  ;;  %s2956_s24 = sshll.u32 (!%p4378_p7), %s561_s20, 3 }
  0xa0   : > { %s562_s13 = scalar_lea.sflag (!%p4378_p7), [#allocation3], %s561_s20  ;;  %s565_s12 = scalar_lea.vmem (!%p4378_p7), [#allocation2], %s2956_s24 }
  0xa4   : > { %3723 = dma.done.wait (%p4379_p2), %s562_s13, 128  }
  0xa5   : > { %3725 = vsyncadd (%p4379_p2), %s562_s13, 4294967168  ;;  %p4380_p13 = scmp.eq.s32.totalorder %s3888_s27, 0 }
  0xa7   : > { %3727 = dma.done.wait (%p4380_p13), [#allocation5], 1024   ;;  %p4381_p8 = pmov %p4380_p13 }
  0xa9   : > { %3729 = vsyncadd (%p4381_p8), [#allocation5], 4294966272  ;;  %p4382_p5 = pmov %p4381_p8 }
  0xab   : > { %3731 = dma.done.wait (%p4382_p5), [#allocation8], 528   ;;  %p4383_p6 = pmov %p4382_p5 }
  0xac   : > { %p4384_p9 = pmov %p4382_p5 }
  0xad   : > { %3733 = vsyncadd (%p4383_p6), [#allocation8], 4294966768 }
  0xae   : > { %3735 = dma.done.wait (%p4384_p9), [#allocation11], 2304   ;;  %p4385_p1 = pmov %p4382_p5 }
  0xb0   : > { %3737 = vsyncadd (%p4385_p1), [#allocation11], 4294964992  ;;  %p4386_p3 = pmov %p4385_p1 }
  0xb1   : > { %p4387_p10 = pmov %p4385_p1 }
  0xb2   : > { %3739 = dma.done.wait (%p4386_p3), [#allocation14], 816  }
  0xb3   : > { %3741 = vsyncadd (%p4387_p10), [#allocation14], 4294966480  ;;  %v3773_v0 = vmov 0   ;;  %v3774_v1 = vmov 0.0   ;;  %v4065_v2 = vld [vmem:[%s565_s12] sm:$0xff]  ;;  %s3775_s2 = smov 12  }
  0xb4   : > { %3398 = vset.pattern.permute.xlu0 %v3773_v0  ;;  %3102 = vmatprep.subr.mxu0 %v3774_v1  ;;  %v675_v3 = vld [vmem:[#allocation4 + $0x30] sm:$0xff]  ;;  %v674_v4 = vld [vmem:[#allocation4 + $0x28] sm:$0xff]  ;;  %v673_v5 = vld [vmem:[#allocation4 + $0x20] sm:$0xff]  ;;  %vm3776_vm0 = vmmov 0   ;;  %v3777_v7 = vmov 31   ;;  %vm665_vm1 = vcmask 97280  }
  0xb5   : > { %3119 = vmatprep.subr.bf16.mxu1 %v3774_v1  ;;  %3400 = vset.pattern.permute.xlu1 %v3773_v0  ;;  %v672_v6 = vld [vmem:[#allocation4 + $0x18] sm:$0xff]  ;;  %v671_v8 = vld [vmem:[#allocation4 + $0x10] sm:$0xff]  ;;  %v670_v9 = vld [vmem:[#allocation4 + $0x8] sm:$0xff]  ;;  %vm667_vm2 = vcmask 359424   ;;  %vm676_vm3 = vcmask 457728   ;;  %s3778_s4 = smov 32  }
  0xb6   : > { %655 = vperm.xlu0 %3398, %v4065_v2   ;;  %662 = vrot.lane.b32.xlu1 %v4065_v2, %s3775_s2  ;;  %v669_v10 = vld [vmem:[#allocation4] sm:$0xff]  ;;  %v3402_v16 = vld [vmem:[#allocation7 + $0x18] sm:$0xff]   ;;  %v3403_v17 = vld [vmem:[#allocation7 + $0x10] sm:$0xff]   ;;  %vm756_vm4 = vcmask 261120   ;;  %vm798_vm5 = vcmask 523264   ;;  %s3779_s18 = smov 96  }
  0xb7   : > { %3103 = vmatpush3.msra.mxu0 %v675_v3  ;;  %3116 = vmatprep.mubr.msk.f32.mxu0 %vm3776_vm0, %v3774_v1  ;;  %v3404_v18 = vld [vmem:[#allocation7 + $0x8] sm:$0xff]   ;;  %v3405_v19 = vld [vmem:[#allocation7] sm:$0xff]   ;;  %v951_v44 = vld [vmem:[#allocation12] sm:$0xff]  ;;  %s3780_s19 = smov 127   ;;  %vm1059_vm8 = vcmask 64512   ;;  %s3781_s16 = smov 64  }
  0xb8   : > { %3104 = vmatprep.subr.mxu0 %v3774_v1  ;;  %3127 = vmatprep.mubr.msk.bf16.mxu1 %vm3776_vm0, %v3774_v1  ;;  %v2968_v27 = vld [vmem:[#allocation9] ss:$0 sm:$0xff]  ;;  %v954_v39 = vld [vmem:[#allocation12 + $0x18] sm:$0xff]  ;;  %v953_v41 = vld [vmem:[#allocation12 + $0x10] sm:$0xff]  ;;  %s4388_s28 = sld [smem:[#allocation26_spill]]  ;;  %p646_p11 = scmp.lt.s32.totalorder %s3888_s27, 1 }
  0xb9   : > { %3105 = vmatpush3.msra.mxu0 %v674_v4  ;;  %3120 = vmatpush3.bf16.msra.mxu1 %v3402_v16  ;;  %v3406_v40 = vld [vmem:[#allocation10 + $0x8] sm:$0xff]   ;;  %v952_v42 = vld [vmem:[#allocation12 + $0x8] sm:$0xff]  ;;  %v3407_v43 = vld [vmem:[#allocation10] sm:$0xff]   ;;  %s4389_s25 = sld [smem:[#allocation27_spill]]  ;;  %vm2796_vm14 = vcmask 23552  }
  0xba   : > { %3399 = vset.pattern.permute.xlu0 %v3777_v7  ;;  %3106 = vmatprep.subr.mxu0 %v3774_v1  ;;  %v2974_v49 = vld [vmem:[%s4335_s5] ss:$0 sm:$0xff]  ;;  %v2981_v55 = vld [vmem:[#allocation13] ss:$0 sm:$0xff]  ;;  %s4396_s27 = smov (!%p646_p11, %s3888_s27), 1 }
  0xbb   : > { %659 = vperm.xlu0 %3399, %v4065_v2   ;;  %3107 = vmatpush3.msra.mxu0 %v673_v5  ;;  %v2975_v51 = vld [vmem:[%s4336_s6] ss:$0 sm:$0xff] }
  0xbc   : > { %3108 = vmatprep.subr.mxu0 %v3774_v1  ;;  %3121 = vmatprep.subr.bf16.mxu1 %v3774_v1 }
  0xbd   : > { %3109 = vmatpush3.msra.mxu0 %v672_v6  ;;  %3122 = vmatpush3.bf16.msra.mxu1 %v3403_v17 }
  0xbe   : > { %3110 = vmatprep.subr.mxu0 %v3774_v1  ;;  %3123 = vmatprep.subr.bf16.mxu1 %v3774_v1 }
  0xbf   : > { %3111 = vmatpush3.msra.mxu0 %v671_v8 }
  0xc0   : > { %3112 = vmatprep.subr.mxu0 %v3774_v1 }
  0xc1   : > { %3113 = vmatpush3.msra.mxu0 %v670_v9  ;;  %3124 = vmatpush3.bf16.msra.mxu1 %v3404_v18 }
  0xc2   : > { %3114 = vmatprep.subr.mxu0 %v3774_v1  ;;  %3125 = vmatprep.subr.bf16.mxu1 %v3774_v1 }
  0xc3   : > { %3115 = vmatpush3.msra.mxu0 %v669_v10 }
  0xc4   : > { %3131 = vmatprep.subr.bf16.mxu0 %v3774_v1 }
  0xc5   : > { %3126 = vmatpush3.bf16.msra.mxu1 %v3405_v19 }
  0xc6   : > { %3139 = vmatprep.subr.mxu1 %v3774_v1 }
 0x128   : > { %v663_v12 = vpop.permute.xlu1 %662 }
 0x131   : > { %v656_v11 = vpop.permute.xlu0 %655 }
 0x132   : > { %v666_v13 = vsel %vm665_vm1, %v656_v11, %v663_v12 }
 0x136   : > { %v660_v14 = vpop.permute.xlu0 %659 }
 0x137   : > { %v668_v15 = vsel %vm667_vm2, %v666_v13, %v660_v14 }
 0x138   : > { %3117 = vmatmul.mubr.msk.f32.vlgmr.msra.gmra.mxu0 %vm676_vm3, %v668_v15 }
 0x139   : > { %3135 = vmatprep.mubr.msk.bf16.mxu0 %vm3776_vm0, %v3774_v1  ;;  %3132 = vmatpush3.bf16.msra.mxu0 %v3406_v40 }
 0x13a   : > { %3133 = vmatprep.subr.bf16.mxu0 %v3774_v1 }
 0x13d   : > { %3134 = vmatpush3.bf16.msra.mxu0 %v3407_v43 }
 0x13e   : > { %3155 = vmatprep.subr.mxu0 %v3774_v1 }
 0x1f8   : > { %v746_v20 = vpop.f32.mrf.mxu0 }
 0x1f9   : > { %v750_v21 = vmul.f32 0.04, %v746_v20  ;;  %v4127_v20 = vld [vmem:[#allocation6] sm:$0xff] }
 0x1fa   : > { %v3118_v22 = vpop.f32.mrf.mxu0  ;;  %vm843_vm9 = vcmp.gt.f32.partialorder %v4127_v20, 0.0 }
 0x1fb   : > { %753 = vrot.lane.b32.xlu1 %v750_v21, %s3778_s4  ;;  %v751_v23 = vsub.f32 %v4065_v2, %v750_v21 }
 0x26d   : > { %v754_v24 = vpop.permute.xlu1 %753 }
 0x26e   : > { %v757_v25 = vsel %vm756_vm4, %v751_v23, %v754_v24 }
 0x26f   : > { %v758_v26 = vpack.c.bf16 %v757_v25, %v757_v25 }
 0x271   : > { %3128 = vmatmul.mubr.msk.bf16.vlgmr.msra.gmra.mxu1 %vm798_vm5, %v758_v26  ;;  %v1170_v26 = vlaneseq }
 0x272   : > { %3147 = vmatprep.mubr.msk.f32.mxu1 %vm3776_vm0, %v3774_v1  ;;  %3140 = vmatpush3.msra.mxu1 %v954_v39 }
 0x273   : > { %3141 = vmatprep.subr.mxu1 %v3774_v1 }
 0x274   : > { %3142 = vmatpush3.msra.mxu1 %v953_v41 }
 0x275   : > { %3143 = vmatprep.subr.mxu1 %v3774_v1 }
 0x276   : > { %3144 = vmatpush3.msra.mxu1 %v952_v42 }
 0x277   : > { %3145 = vmatprep.subr.mxu1 %v3774_v1 }
 0x278   : > { %3146 = vmatpush3.msra.mxu1 %v951_v44 }
 0x279   : > { %3150 = vmatprep.subr.mxu1 %v3774_v1 }
 0x331   : > { %v836_v28 = vpop.f32.mrf.mxu1 }
 0x332   : > { %v4092_v29 = vadd.f32 %v2968_v27, %v836_v28  ;;  %v1171_v27 = vshrl.u32 %v1170_v26, 7 }
 0x333   : > { %v3129_v30 = vpop.f32.mrf.mxu1 }
 0x334   : > { %v844_v31 = vsel %vm756_vm4, %v4092_v29, 0.0  ;;  %v4135_v28 = vsub.s32 0, %v1171_v27  ;;  %v2991_v27 = vld [vmem:[%s4335_s5 + $0x1] ss:$0 sm:$0xff] }
 0x335   : > { %845 = vadd.xlane.f32.xlu1 %v844_v31  ;;  %v839_v32 = vpop.f32.mrf.mxu1 }
 0x337   : > { %v3130_v33 = vpop.f32.mrf.mxu1 }
 0x3be   : > { %v846_v34 = vpop.xlane.xlu1 %845 }
 0x3bf   : > { %v848_v35 = vmul.f32 0.03125, %v846_v34 }
 0x3c1   : > { %v849_v36 = vsub.f32 %v4092_v29, %v848_v35 }
 0x3c3   : > { %v850_v37 = vmul.f32 %v849_v36, %v849_v36 }
 0x3c5   : > { %v851_v38 = vsel %vm756_vm4, %v850_v37, 0.0 }
 0x3c6   : > { %852 = vadd.xlane.f32.xlu0 %v851_v38 }
 0x44f   : > { %v853_v45 = vpop.xlane.xlu0 %852 }
 0x450   : > { %v854_v46 = vmul.f32 0.03125, %v853_v45  ;;  %v2979_v45 = vld [vmem:[%s4338_s8] ss:$0 sm:$0xff] }
 0x452   : > { %v855_v47 = vadd.f32 1e-05, %v854_v46 }
 0x454   : > { %3420 = vrsqrt.f32 %v855_v47 }
 0x461   : > { %v3421_v48 = vpop.eup %3420 }
 0x462   : > { %v857_v50 = vmul.f32 %v3421_v48, %v849_v36 }
 0x464   : > { %v865_v52 = vmul.f32 %v2974_v49, %v857_v50 }
 0x466   : > { %v873_v53 = vadd.f32 %v2975_v51, %v865_v52 }
 0x468   : > { %3148 = vmatmul.mubr.msk.f32.vlgmr.msra.gmra.mxu1 %vm756_vm4, %v873_v53  ;;  %v874_v54 = vpack.c.bf16 %v873_v53, %v873_v53 }
 0x469   : > { %3152 = vmatprep.mubr.msk.f32.mxu1 %vm3776_vm0, %v3774_v1 }
 0x46a   : > { %3136 = vmatmul.mubr.msk.bf16.vlgmr.msra.gmra.mxu0 %vm756_vm4, %v874_v54  ;;  %v3408_v54 = vld [vmem:[#allocation15 + $0x8] sm:$0xff]  }
 0x46b   : > { %3157 = vmatprep.mubr.msk.f32.mxu0 %vm3776_vm0, %v3774_v1 }
 0x528   : > { %v1031_v56 = vpop.f32.mrf.mxu1 }
 0x529   : > { %v1032_v57 = vadd.f32 %v2981_v55, %v1031_v56  ;;  %v3409_v55 = vld [vmem:[#allocation15] sm:$0xff]  }
 0x52a   : > { %v4116_v58 = vpop.f32.mrf.mxu0  ;;  %v3149_v59 = vpop.f32.mrf.mxu1 }
 0x52b   : > { %v1035_v60 = vsub.f32 0.0, %v1032_v57  ;;  %v934_v61 = vmul.f32 0.17677669, %v4116_v58 }
 0x52c   : > { %v3137_v62 = vpop.f32.mrf.mxu0 }
 0x52d   : > { %v1039_v63 = vand.u32 2147483647, %v1035_v60  ;;  %1220 = vrot.lane.b32.xlu1 %v934_v61, %s3779_s18  ;;  %v1036_v14 = vmax.f32 %v1035_v60, 0.0  ;;  %vm1037_vm7 = vcmp.ne.f32.partialorder %v1035_v60, %v1035_v60 }
 0x52e   : > { %v931_v2 = vpop.f32.mrf.mxu0 }
 0x52f   : > { %v1040_v3 = vsub.f32 0.0, %v1039_v63 }
 0x530   : > { %v3138_v4 = vpop.f32.mrf.mxu0 }
 0x531   : > { %v1041_v5 = vmul.f32 1.442695, %v1040_v3 }
 0x533   : > { %3422 = vpow2.f32 %v1041_v5 }
 0x540   : > { %v3423_v6 = vpop.eup %3422 }
 0x541   : > { %v1043_v7 = vadd.f32 1.0, %v3423_v6  ;;  %v1046_v8 = vmul.f32 -0.5, %v3423_v6  ;;  %v1049_v10 = vand.u32 2147483647, %v3423_v6 }
 0x543   : > { %3424 = vlog2.f32 %v1043_v7  ;;  %v1047_v9 = vadd.f32 1.0, %v1046_v8  ;;  %vm1050_vm6 = vcmp.lt.f32.partialorder %v1049_v10, 0.0004427343 }
 0x545   : > { %v1048_v13 = vmul.f32 %v3423_v6, %v1047_v9 }
 0x550   : > { %v3425_v11 = vpop.eup %3424 }
 0x551   : > { %v1045_v12 = vmul.f32 0.6931472, %v3425_v11 }
 0x553   : > { %v1051_v15 = vsel %vm1050_vm6, %v1048_v13, %v1045_v12 }
 0x554   : > { %v1052_v16 = vadd.f32 %v1051_v15, %v1036_v14 }
 0x556   : > { %v1053_v17 = vsel %vm1037_vm7, %v1035_v60, %v1052_v16 }
 0x557   : > { %v1054_v18 = vsub.f32 0.0, %v1053_v17  ;;  %v1567_v17 = vld [vmem:[#allocation12 + $0x38] sm:$0xff] }
 0x559   : > { %1056 = vrot.lane.b32.xlu0 %v1054_v18, %s3780_s19  ;;  %v3410_v18 = vld [vmem:[#allocation10 + $0x18] sm:$0xff]  }
 0x59f   : > { %v1221_v19 = vpop.permute.xlu1 %1220 }
 0x5a0   : > { %3156 = vmatpush3.xpose.msk.msra.mxu0 %vm756_vm4, %v1221_v19  ;;  %v1565_v19 = vld [vmem:[#allocation12 + $0x28] sm:$0xff] }
 0x5a1   : > { %3165 = vmatprep.subr.bf16.mxu0 %v3774_v1 }
 0x5a3   : > { %3158 = vmatmul.mubr.msk.f32.vlgmr.msra.gmra.mxu0 %vm756_vm4, %v4116_v58 }
 0x5a4   : > { %3169 = vmatprep.mubr.msk.bf16.mxu0 %vm3776_vm0, %v3774_v1  ;;  %3166 = vmatpush3.bf16.msra.mxu0 %v3408_v54 }
 0x5a5   : > { %3167 = vmatprep.subr.bf16.mxu0 %v3774_v1 }
 0x5a8   : > { %3168 = vmatpush3.bf16.msra.mxu0 %v3409_v55 }
 0x5a9   : > { %3181 = vmatprep.subr.mxu0 %v3774_v1 }
 0x5cb   : > { %v1057_v21 = vpop.permute.xlu0 %1056 }
 0x5cc   : > { %3151 = vmatpush3.msra.mxu1 %v1057_v21  ;;  %v3411_v21 = vld [vmem:[#allocation10 + $0x10] sm:$0xff]  }
 0x5cd   : > { %3153 = vmatmul.mubr.msk.f32.vlgmr.msra.gmra.mxu1 %vm1059_vm8, %v4127_v20  ;;  %3160 = vmatprep.subr.mxu1 %v3774_v1 }
 0x5ce   : > { %3162 = vmatprep.mubr.msk.f32.mxu1 %vm3776_vm0, %v3774_v1 }
 0x663   : > { %v1293_v22 = vpop.f32.mrf.mxu0 }
 0x665   : > { %v3159_v23 = vpop.f32.mrf.mxu0 }
 0x68d   : > { %v1129_v24 = vpop.f32.mrf.mxu1 }
 0x68e   : > { %1133 = vxpose.xlu0.b32.start.end [1/1] (short) (narrow) %v1129_v24, 8  ;;  %1167 = vperm.xlu1 %3400, %v1129_v24  }
 0x68f   : > { %v3154_v25 = vpop.f32.mrf.mxu1 }
 0x6b7   : > { %1175 = vxpose.xlu1.b32.start.end [1/1] (short) (narrow) %v1032_v57, 8  ;;  %3401 = vset.pattern.permute.xlu0 %v3773_v0 }
 0x709   : > { %v1168_v31 = vpop.permute.xlu1 %1167 }
 0x70a   : > { %v1149_v30 = vpop.trf.xlu0 }
 0x70b   : > { %v1173_v32 = vrot.slane %v1149_v30, %v4135_v28 }
 0x70d   : > { %v1174_v34 = vsub.f32 %v1168_v31, %v1173_v32  ;;  %v2993_v31 = vld [vmem:[%s4336_s6 + $0x1] ss:$0 sm:$0xff] }
 0x733   : > { %v1191_v33 = vpop.trf.xlu1 }
 0x734   : > { %v1210_v35 = vrot.slane %v1191_v33, %v4135_v28 }
 0x736   : > { %v1211_v36 = vadd.f32 %v1210_v35, %v1174_v34  ;;  %v3000_v35 = vld [vmem:[#allocation13 + $0x1] ss:$0 sm:$0xff] }
 0x738   : > { %v1212_v37 = vsel %vm843_vm9, %v1211_v36, -inf }
 0x739   : > { %v1213_v0 = vsel %vm1059_vm8, %v1212_v37, -inf }
 0x73a   : > { %1214 = vmax.xlane.f32.xlu0 %v1213_v0 }
 0x750   : > { %1308 = vrot.lane.b32.xlu0 %v4116_v58, %s3781_s16 }
 0x7c3   : > { %v1215_v38 = vpop.xlane.xlu0 %1214 }
 0x7c4   : > { %v1216_v39 = vsub.f32 %v1212_v37, %v1215_v38  ;;  %v1302_v46 = vsub.f32 0.0, %v1215_v38 }
 0x7c6   : > { %v1217_v40 = vmul.f32 1.442695, %v1216_v39  ;;  %v1303_v47 = vmul.f32 1.442695, %v1302_v46 }
 0x7c7   : > { %v1309_v41 = vpop.permute.xlu0 %1308 }
 0x7c8   : > { %3426 = vpow2.f32 %v1217_v40  ;;  %3161 = vmatpush3.msra.mxu1 %v1309_v41 }
 0x7c9   : > { %3173 = vmatprep.subr.bf16.mxu1 %v3774_v1  ;;  %3428 = vpow2.f32 %v1303_v47 }
 0x7d5   : > { %v3427_v42 = vpop.eup %3426 }
 0x7d6   : > { %v1297_v43 = vmul.f32 %v3427_v42, %v1293_v22  ;;  %v3429_v50 = vpop.eup %3428  ;;  %v1564_v22 = vld [vmem:[#allocation12 + $0x20] sm:$0xff] }
 0x7d8   : > { %v1298_v44 = vsel %vm1059_vm8, %v1297_v43, 0.0 }
 0x7d9   : > { %1299 = vadd.xlane.f32.xlu1 %v1298_v44 }
 0x7ea   : > { %941 = vrot.lane.b32.xlu1 %v2979_v45, %s3779_s18 }
 0x862   : > { %v1300_v48 = vpop.xlane.xlu1 %1299 }
 0x863   : > { %v1301_v49 = vand.u32 2147483647, %v1300_v48 }
 0x865   : > { %v1305_v51 = vmax.f32 %v1301_v49, %v3429_v50 }
 0x866   : > { %v942_v59 = vpop.permute.xlu1 %941 }
 0x867   : > { %3430 = vrcp.f32 %v1305_v51  ;;  %v944_v60 = vadd.f32 %v942_v59, %v4116_v58 }
 0x869   : > { %v2980_v61 = vmul.f32 -1.442695, %v944_v60 }
 0x86b   : > { %3432 = vpow2.f32 %v2980_v61 }
 0x874   : > { %v3431_v52 = vpop.eup %3430 }
 0x875   : > { %v1307_v53 = vmul.f32 %v3431_v52, %v1297_v43 }
 0x877   : > { %3163 = vmatmul.mubr.msk.f32.vlgmr.msra.gmra.mxu1 %vm1059_vm8, %v1307_v53 }
 0x878   : > { %3177 = vmatprep.mubr.msk.bf16.mxu1 %vm3776_vm0, %v3774_v1  ;;  %v3433_v62 = vpop.eup %3432  ;;  %3174 = vmatpush3.bf16.msra.mxu1 %v3410_v18 }
 0x879   : > { %v948_v63 = vadd.f32 1.0, %v3433_v62  ;;  %3175 = vmatprep.subr.bf16.mxu1 %v3774_v1 }
 0x87b   : > { %3434 = vrcp.f32 %v948_v63 }
 0x87c   : > { %3176 = vmatpush3.bf16.msra.mxu1 %v3411_v21 }
 0x87d   : > { %3192 = vmatprep.subr.mxu1 %v3774_v1 }
 0x888   : > { %v3435_v2 = vpop.eup %3434 }
 0x937   : > { %v1380_v56 = vpop.f32.mrf.mxu1 }
 0x938   : > { %1385 = vrot.lane.b32.xlu0 %v1380_v56, %s3779_s18 }
 0x939   : > { %v3164_v57 = vpop.f32.mrf.mxu1 }
 0x9aa   : > { %v1386_v3 = vpop.permute.xlu0 %1385 }
 0x9ab   : > { %v1388_v4 = vmul.f32 %v3435_v2, %v1386_v3 }
 0x9ad   : > { %v1389_v5 = vpack.c.bf16 %v1388_v4, %v1388_v4 }
 0x9af   : > { %1395 = vrot.lane.b32.xlu1 %v1389_v5, %s3778_s4 }
 0xa21   : > { %v1396_v6 = vpop.permute.xlu1 %1395 }
 0xa22   : > { %3170 = vmatmul.mubr.msk.bf16.vlgmr.msra.gmra.mxu0 %vm756_vm4, %v1396_v6 }
 0xa23   : > { %3189 = vmatprep.mubr.msk.f32.mxu0 %vm3776_vm0, %v3774_v1  ;;  %3182 = vmatpush3.msra.mxu0 %v1567_v17 }
 0xa24   : > { %3183 = vmatprep.subr.mxu0 %v3774_v1 }
 0xae2   : > { %v1446_v7 = vpop.f32.mrf.mxu0 }
 0xae3   : > { %v4163_v58 = vadd.f32 %v1446_v7, %v4092_v29  ;;  %v1566_v29 = vld [vmem:[#allocation12 + $0x30] sm:$0xff] }
 0xae4   : > { %v3171_v8 = vpop.f32.mrf.mxu0  ;;  %3184 = vmatpush3.msra.mxu0 %v1566_v29 }
 0xae5   : > { %v1453_v9 = vsel %vm756_vm4, %v4163_v58, 0.0  ;;  %3185 = vmatprep.subr.mxu0 %v3774_v1 }
 0xae6   : > { %1454 = vadd.xlane.f32.xlu0 %v1453_v9  ;;  %v1449_v10 = vpop.f32.mrf.mxu0  ;;  %3186 = vmatpush3.msra.mxu0 %v1565_v19 }
 0xae7   : > { %3187 = vmatprep.subr.mxu0 %v3774_v1 }
 0xae8   : > { %v3172_v11 = vpop.f32.mrf.mxu0  ;;  %3188 = vmatpush3.msra.mxu0 %v1564_v22 }
 0xae9   : > { %3197 = vmatprep.subr.mxu0 %v3774_v1 }
 0xb6f   : > { %v1455_v12 = vpop.xlane.xlu0 %1454 }
 0xb70   : > { %v1456_v13 = vmul.f32 0.03125, %v1455_v12 }
 0xb72   : > { %v1457_v14 = vsub.f32 %v4163_v58, %v1456_v13 }
 0xb74   : > { %v1458_v15 = vmul.f32 %v1457_v14, %v1457_v14 }
 0xb76   : > { %v1459_v16 = vsel %vm756_vm4, %v1458_v15, 0.0 }
 0xb77   : > { %1460 = vadd.xlane.f32.xlu1 %v1459_v16 }
 0xc00   : > { %v1461_v23 = vpop.xlane.xlu1 %1460 }
 0xc01   : > { %v1462_v24 = vmul.f32 0.03125, %v1461_v23 }
 0xc03   : > { %v1463_v25 = vadd.f32 1e-05, %v1462_v24 }
 0xc05   : > { %3436 = vrsqrt.f32 %v1463_v25 }
 0xc12   : > { %v3437_v26 = vpop.eup %3436 }
 0xc13   : > { %v1465_v30 = vmul.f32 %v3437_v26, %v1457_v14  ;;  %v2998_v14 = vld [vmem:[%s4338_s8 + $0x1] ss:$0 sm:$0xff] }
 0xc15   : > { %v1474_v32 = vmul.f32 %v2991_v27, %v1465_v30 }
 0xc17   : > { %v1483_v33 = vadd.f32 %v2993_v31, %v1474_v32  ;;  %v3412_v32 = vld [vmem:[#allocation15 + $0x18] sm:$0xff]  }
 0xc19   : > { %3190 = vmatmul.mubr.msk.f32.vlgmr.msra.gmra.mxu0 %vm756_vm4, %v1483_v33  ;;  %v1484_v34 = vpack.c.bf16 %v1483_v33, %v1483_v33  ;;  %v3413_v33 = vld [vmem:[#allocation15 + $0x10] sm:$0xff]  }
 0xc1a   : > { %3199 = vmatprep.mubr.msk.f32.mxu0 %vm3776_vm0, %v3774_v1 }
 0xc1b   : > { %3178 = vmatmul.mubr.msk.bf16.vlgmr.msra.gmra.mxu1 %vm756_vm4, %v1484_v34 }
 0xc1c   : > { %3194 = vmatprep.mubr.msk.f32.mxu1 %vm3776_vm0, %v3774_v1 }
 0xcd9   : > { %v1645_v36 = vpop.f32.mrf.mxu0 }
 0xcda   : > { %v1646_v37 = vadd.f32 %v3000_v35, %v1645_v36 }
 0xcdb   : > { %v4187_v0 = vpop.f32.mrf.mxu1  ;;  %v3191_v38 = vpop.f32.mrf.mxu0 }
 0xcdc   : > { %v1649_v39 = vsub.f32 0.0, %v1646_v37  ;;  %v1545_v40 = vmul.f32 0.17677669, %v4187_v0 }
 0xcdd   : > { %v3179_v41 = vpop.f32.mrf.mxu1 }
 0xcde   : > { %v1653_v42 = vand.u32 2147483647, %v1649_v39  ;;  %1830 = vrot.lane.b32.xlu1 %v1545_v40, %s3779_s18  ;;  %v1650_v55 = vmax.f32 %v1649_v39, 0.0  ;;  %vm1651_vm11 = vcmp.ne.f32.partialorder %v1649_v39, %v1649_v39 }
 0xcdf   : > { %v1542_v43 = vpop.f32.mrf.mxu1 }
 0xce0   : > { %v1654_v44 = vsub.f32 0.0, %v1653_v42 }
 0xce1   : > { %v3180_v45 = vpop.f32.mrf.mxu1 }
 0xce2   : > { %v1655_v46 = vmul.f32 1.442695, %v1654_v44 }
 0xce4   : > { %3438 = vpow2.f32 %v1655_v46 }
 0xcf1   : > { %v3439_v47 = vpop.eup %3438 }
 0xcf2   : > { %v1657_v48 = vadd.f32 1.0, %v3439_v47  ;;  %v1660_v49 = vmul.f32 -0.5, %v3439_v47  ;;  %v1663_v51 = vand.u32 2147483647, %v3439_v47 }
 0xcf4   : > { %3440 = vlog2.f32 %v1657_v48  ;;  %v1661_v50 = vadd.f32 1.0, %v1660_v49  ;;  %vm1664_vm10 = vcmp.lt.f32.partialorder %v1663_v51, 0.0004427343 }
 0xcf6   : > { %v1662_v54 = vmul.f32 %v3439_v47, %v1661_v50 }
 0xd01   : > { %v3441_v52 = vpop.eup %3440 }
 0xd02   : > { %v1659_v53 = vmul.f32 0.6931472, %v3441_v52 }
 0xd04   : > { %v1665_v56 = vsel %vm1664_vm10, %v1662_v54, %v1659_v53 }
 0xd05   : > { %v1666_v57 = vadd.f32 %v1665_v56, %v1650_v55  ;;  %v2178_v56 = vld [vmem:[#allocation12 + $0x58] sm:$0xff] }
 0xd07   : > { %v1667_v59 = vsel %vm1651_vm11, %v1649_v39, %v1666_v57  ;;  %v3414_v57 = vld [vmem:[#allocation10 + $0x28] sm:$0xff]  }
 0xd08   : > { %v1668_v60 = vsub.f32 0.0, %v1667_v59  ;;  %v2176_v59 = vld [vmem:[#allocation12 + $0x48] sm:$0xff] }
 0xd0a   : > { %1670 = vrot.lane.b32.xlu0 %v1668_v60, %s3780_s19  ;;  %v3415_v60 = vld [vmem:[#allocation10 + $0x20] sm:$0xff]  }
 0xd50   : > { %v1831_v61 = vpop.permute.xlu1 %1830 }
 0xd51   : > { %3198 = vmatpush3.xpose.msk.msra.mxu0 %vm756_vm4, %v1831_v61  ;;  %v2175_v61 = vld [vmem:[#allocation12 + $0x40] sm:$0xff] }
 0xd52   : > { %3207 = vmatprep.subr.bf16.mxu0 %v3774_v1 }
 0xd54   : > { %3200 = vmatmul.mubr.msk.f32.vlgmr.msra.gmra.mxu0 %vm756_vm4, %v4187_v0 }
 0xd55   : > { %3211 = vmatprep.mubr.msk.bf16.mxu0 %vm3776_vm0, %v3774_v1  ;;  %3208 = vmatpush3.bf16.msra.mxu0 %v3412_v32 }
 0xd56   : > { %3209 = vmatprep.subr.bf16.mxu0 %v3774_v1 }
 0xd59   : > { %3210 = vmatpush3.bf16.msra.mxu0 %v3413_v33 }
 0xd5a   : > { %3223 = vmatprep.subr.mxu0 %v3774_v1 }
 0xd7c   : > { %v1671_v62 = vpop.permute.xlu0 %1670 }
 0xd7d   : > { %3193 = vmatpush3.msra.mxu1 %v1671_v62 }
 0xd7e   : > { %3195 = vmatmul.mubr.msk.f32.vlgmr.msra.gmra.mxu1 %vm1059_vm8, %v4127_v20  ;;  %3202 = vmatprep.subr.mxu1 %v3774_v1 }
 0xd7f   : > { %3204 = vmatprep.mubr.msk.f32.mxu1 %vm3776_vm0, %v3774_v1 }
 0xe14   : > { %v1903_v63 = vpop.f32.mrf.mxu0 }
 0xe16   : > { %v3201_v2 = vpop.f32.mrf.mxu0 }
 0xe3e   : > { %v1739_v3 = vpop.f32.mrf.mxu1 }
 0xe3f   : > { %1743 = vxpose.xlu1.b32.start.end [1/1] (short) (narrow) %v1739_v3, 8  ;;  %1777 = vperm.xlu0 %3401, %v1739_v3  }
 0xe40   : > { %v3196_v4 = vpop.f32.mrf.mxu1 }
 0xe41   : > { %v3010_v4 = vld [vmem:[%s4335_s5 + $0x2] ss:$0 sm:$0xff] }
 0xe5d   : > { %1785 = vxpose.xlu0.b32.start.end [1/1] (short) (narrow) %v1646_v37, 8 }
 0xeba   : > { %v1778_v6 = vpop.permute.xlu0 %1777 }
 0xebb   : > { %v1759_v5 = vpop.trf.xlu1 }
 0xebc   : > { %v1783_v7 = vrot.slane %v1759_v5, %v4135_v28 }
 0xebe   : > { %v1784_v9 = vsub.f32 %v1778_v6, %v1783_v7  ;;  %v3012_v6 = vld [vmem:[%s4336_s6 + $0x2] ss:$0 sm:$0xff] }
 0xed9   : > { %v1801_v8 = vpop.trf.xlu0 }
 0xeda   : > { %v1820_v10 = vrot.slane %v1801_v8, %v4135_v28 }
 0xedc   : > { %v1821_v11 = vadd.f32 %v1820_v10, %v1784_v9  ;;  %v3019_v10 = vld [vmem:[#allocation13 + $0x2] ss:$0 sm:$0xff] }
 0xede   : > { %v1822_v12 = vsel %vm843_vm9, %v1821_v11, -inf }
 0xedf   : > { %v1823_v13 = vsel %vm1059_vm8, %v1822_v12, -inf }
 0xee0   : > { %1824 = vmax.xlane.f32.xlu0 %v1823_v13 }
 0xef6   : > { %1553 = vrot.lane.b32.xlu0 %v2998_v14, %s3779_s18 }
 0xf69   : > { %v1825_v15 = vpop.xlane.xlu0 %1824 }
 0xf6a   : > { %v1826_v16 = vsub.f32 %v1822_v12, %v1825_v15  ;;  %v1912_v21 = vsub.f32 0.0, %v1825_v15 }
 0xf6c   : > { %v1827_v17 = vmul.f32 1.442695, %v1826_v16  ;;  %v1913_v22 = vmul.f32 1.442695, %v1912_v21 }
 0xf6d   : > { %v1554_v36 = vpop.permute.xlu0 %1553 }
 0xf6e   : > { %3442 = vpow2.f32 %v1827_v17  ;;  %v1556_v37 = vadd.f32 %v1554_v36, %v4187_v0 }
 0xf6f   : > { %3444 = vpow2.f32 %v1913_v22 }
 0xf70   : > { %v2999_v38 = vmul.f32 -1.442695, %v1556_v37 }
 0xf7b   : > { %v3443_v18 = vpop.eup %3442 }
 0xf7c   : > { %v1907_v29 = vmul.f32 %v3443_v18, %v1903_v63  ;;  %v3445_v25 = vpop.eup %3444 }
 0xf7e   : > { %v1908_v19 = vsel %vm1059_vm8, %v1907_v29, 0.0 }
 0xf7f   : > { %1909 = vadd.xlane.f32.xlu1 %v1908_v19 }
 0xf90   : > { %1918 = vrot.lane.b32.xlu1 %v4187_v0, %s3781_s16 }
0x1008   : > { %v1910_v23 = vpop.xlane.xlu1 %1909 }
0x1009   : > { %v1911_v24 = vand.u32 2147483647, %v1910_v23 }
0x100b   : > { %v1915_v26 = vmax.f32 %v1911_v24, %v3445_v25 }
0x100c   : > { %v1919_v27 = vpop.permute.xlu1 %1918 }
0x100d   : > { %3446 = vrcp.f32 %v1915_v26  ;;  %3203 = vmatpush3.msra.mxu1 %v1919_v27 }
0x100e   : > { %3215 = vmatprep.subr.bf16.mxu1 %v3774_v1  ;;  %3448 = vpow2.f32 %v2999_v38 }
0x101a   : > { %v3447_v30 = vpop.eup %3446 }
0x101b   : > { %v1917_v31 = vmul.f32 %v3447_v30, %v1907_v29  ;;  %v3449_v39 = vpop.eup %3448 }
0x101c   : > { %v1560_v40 = vadd.f32 1.0, %v3449_v39 }
0x101d   : > { %3205 = vmatmul.mubr.msk.f32.vlgmr.msra.gmra.mxu1 %vm1059_vm8, %v1917_v31 }
0x101e   : > { %3219 = vmatprep.mubr.msk.bf16.mxu1 %vm3776_vm0, %v3774_v1  ;;  %3450 = vrcp.f32 %v1560_v40  ;;  %3216 = vmatpush3.bf16.msra.mxu1 %v3414_v57 }
0x101f   : > { %3217 = vmatprep.subr.bf16.mxu1 %v3774_v1 }
0x1022   : > { %3218 = vmatpush3.bf16.msra.mxu1 %v3415_v60 }
0x1023   : > { %3234 = vmatprep.subr.mxu1 %v3774_v1 }
0x102b   : > { %v3451_v41 = vpop.eup %3450 }
0x10dd   : > { %v1990_v34 = vpop.f32.mrf.mxu1 }
0x10de   : > { %1995 = vrot.lane.b32.xlu1 %v1990_v34, %s3779_s18 }
0x10df   : > { %v3206_v35 = vpop.f32.mrf.mxu1 }
0x1150   : > { %v1996_v42 = vpop.permute.xlu1 %1995 }
0x1151   : > { %v1998_v43 = vmul.f32 %v3451_v41, %v1996_v42 }
0x1153   : > { %v1999_v44 = vpack.c.bf16 %v1998_v43, %v1998_v43 }
0x1155   : > { %2006 = vrot.lane.b32.xlu1 %v1999_v44, %s3778_s4 }
0x11c7   : > { %v2007_v45 = vpop.permute.xlu1 %2006 }
0x11c8   : > { %3212 = vmatmul.mubr.msk.bf16.vlgmr.msra.gmra.mxu0 %vm756_vm4, %v2007_v45 }
0x11c9   : > { %3231 = vmatprep.mubr.msk.f32.mxu0 %vm3776_vm0, %v3774_v1  ;;  %3224 = vmatpush3.msra.mxu0 %v2178_v56 }
0x11ca   : > { %3225 = vmatprep.subr.mxu0 %v3774_v1 }
0x1288   : > { %v2057_v46 = vpop.f32.mrf.mxu0 }
0x1289   : > { %v4228_v0 = vadd.f32 %v2057_v46, %v4163_v58  ;;  %v2177_v58 = vld [vmem:[#allocation12 + $0x50] sm:$0xff] }
0x128a   : > { %v3213_v47 = vpop.f32.mrf.mxu0  ;;  %3226 = vmatpush3.msra.mxu0 %v2177_v58 }
0x128b   : > { %v2064_v48 = vsel %vm756_vm4, %v4228_v0, 0.0  ;;  %3227 = vmatprep.subr.mxu0 %v3774_v1 }
0x128c   : > { %2065 = vadd.xlane.f32.xlu0 %v2064_v48  ;;  %v2060_v49 = vpop.f32.mrf.mxu0  ;;  %3228 = vmatpush3.msra.mxu0 %v2176_v59 }
0x128d   : > { %3229 = vmatprep.subr.mxu0 %v3774_v1 }
0x128e   : > { %v3214_v50 = vpop.f32.mrf.mxu0  ;;  %3230 = vmatpush3.msra.mxu0 %v2175_v61 }
0x128f   : > { %3239 = vmatprep.subr.mxu0 %v3774_v1 }
0x1315   : > { %v2066_v51 = vpop.xlane.xlu0 %2065 }
0x1316   : > { %v2067_v52 = vmul.f32 0.03125, %v2066_v51 }
0x1318   : > { %v2068_v53 = vsub.f32 %v4228_v0, %v2067_v52 }
0x131a   : > { %v2069_v54 = vmul.f32 %v2068_v53, %v2068_v53 }
0x131c   : > { %v2070_v55 = vsel %vm756_vm4, %v2069_v54, 0.0 }
0x131d   : > { %2071 = vadd.xlane.f32.xlu1 %v2070_v55 }
0x13a6   : > { %v2072_v62 = vpop.xlane.xlu1 %2071 }
0x13a7   : > { %v2073_v63 = vmul.f32 0.03125, %v2072_v62 }
0x13a9   : > { %v2074_v2 = vadd.f32 1e-05, %v2073_v63 }
0x13ab   : > { %3452 = vrsqrt.f32 %v2074_v2 }
0x13b8   : > { %v3453_v3 = vpop.eup %3452 }
0x13b9   : > { %v2076_v5 = vmul.f32 %v3453_v3, %v2068_v53 }
0x13bb   : > { %v2085_v7 = vmul.f32 %v3010_v4, %v2076_v5  ;;  %v3416_v5 = vld [vmem:[#allocation15 + $0x28] sm:$0xff]  }
0x13bd   : > { %v2094_v8 = vadd.f32 %v3012_v6, %v2085_v7  ;;  %v3417_v6 = vld [vmem:[#allocation15 + $0x20] sm:$0xff]  }
0x13bf   : > { %3232 = vmatmul.mubr.msk.f32.vlgmr.msra.gmra.mxu0 %vm756_vm4, %v2094_v8  ;;  %v2095_v9 = vpack.c.bf16 %v2094_v8, %v2094_v8 }
0x13c0   : > { %3241 = vmatprep.mubr.msk.f32.mxu0 %vm3776_vm0, %v3774_v1 }
0x13c1   : > { %3220 = vmatmul.mubr.msk.bf16.vlgmr.msra.gmra.mxu1 %vm756_vm4, %v2095_v9 }
0x13c2   : > { %3236 = vmatprep.mubr.msk.f32.mxu1 %vm3776_vm0, %v3774_v1 }
0x147f   : > { %v2256_v11 = vpop.f32.mrf.mxu0 }
0x1480   : > { %v2257_v12 = vadd.f32 %v3019_v10, %v2256_v11 }
0x1481   : > { %v4252_v13 = vpop.f32.mrf.mxu1  ;;  %v3233_v14 = vpop.f32.mrf.mxu0 }
0x1482   : > { %v2260_v15 = vsub.f32 0.0, %v2257_v12  ;;  %v2156_v16 = vmul.f32 0.17677669, %v4252_v13 }
0x1483   : > { %v3221_v17 = vpop.f32.mrf.mxu1 }
0x1484   : > { %v2264_v18 = vand.u32 2147483647, %v2260_v15  ;;  %2441 = vrot.lane.b32.xlu1 %v2156_v16, %s3779_s18  ;;  %v2261_v33 = vmax.f32 %v2260_v15, 0.0  ;;  %vm2262_vm13 = vcmp.ne.f32.partialorder %v2260_v15, %v2260_v15 }
0x1485   : > { %v2153_v29 = vpop.f32.mrf.mxu1 }
0x1486   : > { %v2265_v19 = vsub.f32 0.0, %v2264_v18 }
0x1487   : > { %v3222_v21 = vpop.f32.mrf.mxu1 }
0x1488   : > { %v2266_v22 = vmul.f32 1.442695, %v2265_v19 }
0x148a   : > { %3454 = vpow2.f32 %v2266_v22 }
0x1497   : > { %v3455_v23 = vpop.eup %3454 }
0x1498   : > { %v2268_v24 = vadd.f32 1.0, %v3455_v23  ;;  %v2271_v25 = vmul.f32 -0.5, %v3455_v23  ;;  %v2274_v27 = vand.u32 2147483647, %v3455_v23 }
0x149a   : > { %3456 = vlog2.f32 %v2268_v24  ;;  %v2272_v26 = vadd.f32 1.0, %v2271_v25  ;;  %vm2275_vm12 = vcmp.lt.f32.partialorder %v2274_v27, 0.0004427343  ;;  %v2709_v24 = vld [vmem:[%s4345_s15] sm:$0xff]  ;;  %v2710_v25 = vld [vmem:[%s4345_s15 + $0x8] sm:$0xff] }
0x149c   : > { %v2273_v32 = vmul.f32 %v3455_v23, %v2272_v26 }
0x14a7   : > { %v3457_v30 = vpop.eup %3456 }
0x14a8   : > { %v2270_v31 = vmul.f32 0.6931472, %v3457_v30 }
0x14aa   : > { %v2276_v34 = vsel %vm2275_vm12, %v2273_v32, %v2270_v31  ;;  %v3418_v32 = vld [vmem:[%s4344_s14] sm:$0xff]  }
0x14ab   : > { %v2277_v35 = vadd.f32 %v2276_v34, %v2261_v33  ;;  %v3419_v33 = vld [vmem:[%s4344_s14 + $0x8] sm:$0xff]  }
0x14ad   : > { %v2278_v36 = vsel %vm2262_vm13, %v2260_v15, %v2277_v35 }
0x14ae   : > { %v2279_v37 = vsub.f32 0.0, %v2278_v36 }
0x14b0   : > { %2281 = vrot.lane.b32.xlu0 %v2279_v37, %s3780_s19  ;;  %s3035_s19 = sshll.u32 %s4396_s27, 4 }
0x14f6   : > { %v2442_v38 = vpop.permute.xlu1 %2441 }
0x14f7   : > { %3240 = vmatpush3.xpose.msk.msra.mxu0 %vm756_vm4, %v2442_v38  ;;  %v3028_v38 = vld [vmem:[%s4388_s28] ss:$0 sm:$0xff] }
0x14f8   : > { %3249 = vmatprep.subr.bf16.mxu0 %v3774_v1 }
0x14fa   : > { %3242 = vmatmul.mubr.msk.f32.vlgmr.msra.gmra.mxu0 %vm756_vm4, %v4252_v13 }
0x14fb   : > { %3253 = vmatprep.mubr.msk.bf16.mxu0 %vm3776_vm0, %v3774_v1  ;;  %3250 = vmatpush3.bf16.msra.mxu0 %v3416_v5 }
0x14fc   : > { %3251 = vmatprep.subr.bf16.mxu0 %v3774_v1 }
0x14ff   : > { %3252 = vmatpush3.bf16.msra.mxu0 %v3417_v6 }
0x1522   : > { %v2282_v39 = vpop.permute.xlu0 %2281 }
0x1523   : > { %3235 = vmatpush3.msra.mxu1 %v2282_v39 }
0x1524   : > { %3237 = vmatmul.mubr.msk.f32.vlgmr.msra.gmra.mxu1 %vm1059_vm8, %v4127_v20  ;;  %3244 = vmatprep.subr.mxu1 %v3774_v1  ;;  %v3017_v20 = vld [vmem:[%s4338_s8 + $0x2] ss:$0 sm:$0xff] }
0x1525   : > { %3246 = vmatprep.mubr.msk.f32.mxu1 %vm3776_vm0, %v3774_v1 }
0x15ba   : > { %v2514_v40 = vpop.f32.mrf.mxu0 }
0x15bc   : > { %v3243_v41 = vpop.f32.mrf.mxu0 }
0x15e4   : > { %v2350_v42 = vpop.f32.mrf.mxu1 }
0x15e5   : > { %2354 = vxpose.xlu1.b32.start.end [1/1] (short) (narrow) %v2350_v42, 8  ;;  %2388 = vperm.xlu0 %3401, %v2350_v42  }
0x15e6   : > { %v3238_v43 = vpop.f32.mrf.mxu1 }
0x1603   : > { %2396 = vxpose.xlu0.b32.start.end [1/1] (short) (narrow) %v2257_v12, 8 }
0x1660   : > { %v2389_v45 = vpop.permute.xlu0 %2388 }
0x1661   : > { %v2370_v44 = vpop.trf.xlu1 }
0x1662   : > { %v2394_v46 = vrot.slane %v2370_v44, %v4135_v28 }
0x1664   : > { %v2395_v48 = vsub.f32 %v2389_v45, %v2394_v46 }
0x167f   : > { %v2412_v47 = vpop.trf.xlu0 }
0x1680   : > { %v2431_v49 = vrot.slane %v2412_v47, %v4135_v28 }
0x1682   : > { %v2432_v50 = vadd.f32 %v2431_v49, %v2395_v48 }
0x1684   : > { %v2433_v51 = vsel %vm843_vm9, %v2432_v50, -inf }
0x1685   : > { %v2434_v52 = vsel %vm1059_vm8, %v2433_v51, -inf }
0x1686   : > { %2435 = vmax.xlane.f32.xlu0 %v2434_v52 }
0x169c   : > { %2529 = vrot.lane.b32.xlu0 %v4252_v13, %s3781_s16  ;;  %s4390_s16 = sld [smem:[#allocation28_spill]] }
0x16a2   : > { %s650_s21 = scalar_lea.vmem %s4390_s16, %s3035_s19 }
0x170f   : > { %v2436_v53 = vpop.xlane.xlu0 %2435 }
0x1710   : > { %v2437_v54 = vsub.f32 %v2433_v51, %v2436_v53  ;;  %v2523_v59 = vsub.f32 0.0, %v2436_v53 }
0x1712   : > { %v2438_v55 = vmul.f32 1.442695, %v2437_v54  ;;  %v2524_v60 = vmul.f32 1.442695, %v2523_v59 }
0x1713   : > { %v2530_v56 = vpop.permute.xlu0 %2529 }
0x1714   : > { %3458 = vpow2.f32 %v2438_v55  ;;  %3245 = vmatpush3.msra.mxu1 %v2530_v56 }
0x1715   : > { %3257 = vmatprep.subr.bf16.mxu1 %v3774_v1  ;;  %3460 = vpow2.f32 %v2524_v60 }
0x1721   : > { %v3459_v57 = vpop.eup %3458 }
0x1722   : > { %v2518_v28 = vmul.f32 %v3459_v57, %v2514_v40  ;;  %v3461_v63 = vpop.eup %3460  ;;  %v3029_v40 = vld [vmem:[%s4389_s25] ss:$0 sm:$0xff] }
0x1724   : > { %v2519_v58 = vsel %vm1059_vm8, %v2518_v28, 0.0 }
0x1725   : > { %2520 = vadd.xlane.f32.xlu1 %v2519_v58 }
0x1736   : > { %2164 = vrot.lane.b32.xlu1 %v3017_v20, %s3779_s18 }
0x17ae   : > { %v2521_v61 = vpop.xlane.xlu1 %2520 }
0x17af   : > { %v2522_v62 = vand.u32 2147483647, %v2521_v61 }
0x17b1   : > { %v2526_v2 = vmax.f32 %v2522_v62, %v3461_v63 }
0x17b2   : > { %v2165_v9 = vpop.permute.xlu1 %2164 }
0x17b3   : > { %3462 = vrcp.f32 %v2526_v2  ;;  %v2167_v10 = vadd.f32 %v2165_v9, %v4252_v13 }
0x17b5   : > { %v3018_v11 = vmul.f32 -1.442695, %v2167_v10 }
0x17b7   : > { %3464 = vpow2.f32 %v3018_v11 }
0x17c0   : > { %v3463_v3 = vpop.eup %3462 }
0x17c1   : > { %v2528_v4 = vmul.f32 %v3463_v3, %v2518_v28 }
0x17c3   : > { %3247 = vmatmul.mubr.msk.f32.vlgmr.msra.gmra.mxu1 %vm1059_vm8, %v2528_v4 }
0x17c4   : > { %3259 = vmatprep.mubr.msk.bf16.mxu1 %vm3776_vm0, %v3774_v1  ;;  %v3465_v12 = vpop.eup %3464 }
0x17c5   : > { %v2171_v14 = vadd.f32 1.0, %v3465_v12 }
0x17c7   : > { %3466 = vrcp.f32 %v2171_v14 }
0x17d4   : > { %v3467_v15 = vpop.eup %3466 }
0x1883   : > { %v2601_v7 = vpop.f32.mrf.mxu1 }
0x1884   : > { %2606 = vrot.lane.b32.xlu1 %v2601_v7, %s3779_s18 }
0x1885   : > { %v3248_v8 = vpop.f32.mrf.mxu1 }
0x18f6   : > { %v2607_v16 = vpop.permute.xlu1 %2606 }
0x18f7   : > { %v2609_v17 = vmul.f32 %v3467_v15, %v2607_v16 }
0x18f9   : > { %v2610_v18 = vpack.c.bf16 %v2609_v17, %v2609_v17 }
0x18fb   : > { %2617 = vrot.lane.b32.xlu0 %v2610_v18, %s3778_s4 }
0x196d   : > { %v2618_v1 = vpop.permute.xlu0 %2617 }
0x196e   : > { %3254 = vmatmul.mubr.msk.bf16.vlgmr.msra.gmra.mxu0 %vm756_vm4, %v2618_v1 }
0x1a2e   : > { %v2668_v29 = vpop.f32.mrf.mxu0 }
0x1a2f   : > { %v2674_v19 = vadd.f32 %v2668_v29, %v4228_v0 }
0x1a30   : > { %v3255_v21 = vpop.f32.mrf.mxu0 }
0x1a31   : > { %v2675_v13 = vsel %vm756_vm4, %v2674_v19, 0.0 }
0x1a32   : > { %2676 = vadd.xlane.f32.xlu1 %v2675_v13  ;;  %v2671_v22 = vpop.f32.mrf.mxu0 }
0x1a34   : > { %v3256_v23 = vpop.f32.mrf.mxu0 }
0x1a43   : > { %2713 = vperm.xlu1 %3400, %v2709_v24  }
0x1a47   : > { %2718 = vperm.xlu1 %3400, %v2710_v25  }
0x1abb   : > { %v2677_v26 = vpop.xlane.xlu1 %2676 }
0x1abc   : > { %v2678_v27 = vmul.f32 0.03125, %v2677_v26 }
0x1abe   : > { %v2679_v30 = vsub.f32 %v2674_v19, %v2678_v27 }
0x1abf   : > { %v2714_v46 = vpop.permute.xlu1 %2713 }
0x1ac0   : > { %v2680_v0 = vmul.f32 %v2679_v30, %v2679_v30 }
0x1ac2   : > { %v2681_v31 = vsel %vm756_vm4, %v2680_v0, 0.0 }
0x1ac3   : > { %2682 = vadd.xlane.f32.xlu0 %v2681_v31  ;;  %v2719_v50 = vpop.permute.xlu1 %2718 }
0x1af0   : > { %2733 = vxpose.xlu0.c.b16.start [1/2] (short) (narrow) %v3418_v32, 16 }
0x1af4   : > { %2734 = vxpose.xlu0.c.b16.end [2/2] (short) (narrow) %v3419_v33, 16 }
0x1b4c   : > { %v2683_v34 = vpop.xlane.xlu0 %2682 }
0x1b4d   : > { %v2684_v35 = vmul.f32 0.03125, %v2683_v34 }
0x1b4f   : > { %v2685_v36 = vadd.f32 1e-05, %v2684_v35 }
0x1b51   : > { %3468 = vrsqrt.f32 %v2685_v36 }
0x1b52   : > { %v2741_v45 = vpop.trf.xlu0 }
0x1b5e   : > { %v3469_v37 = vpop.eup %3468 }
0x1b5f   : > { %v2687_v39 = vmul.f32 %v3469_v37, %v2679_v30 }
0x1b61   : > { %v2695_v41 = vmul.f32 %v3028_v38, %v2687_v39 }
0x1b63   : > { %v2703_v42 = vadd.f32 %v3029_v40, %v2695_v41 }
0x1b65   : > { %v2708_v43 = vpack.c.bf16 %v2703_v42, %v2703_v42 }
0x1b67   : > { %v2753_v44 = vsel %vm756_vm4, %v2708_v43, 0 }
0x1b68   : > { %3258 = vmatpush3.bf16.xpose.msra.mxu1 %v2753_v44 }
0x1b6f   : > { %3260 = vmatmul.mubr.msk.bf16.vlgmr.msra.gmra.mxu1 %vm756_vm4, %v2741_v45 }
0x1c2f   : > { %v2789_v47 = vpop.f32.mrf.mxu1 }
0x1c30   : > { %v2790_v48 = vadd.f32 %v2789_v47, %v2714_v46 }
0x1c31   : > { %v3261_v49 = vpop.f32.mrf.mxu1 }
0x1c32   : > { %2797 = vst.msk [vmem:[%s650_s21] sm:$0xff] %vm2796_vm14, %v2790_v48 }
0x1c33   : > { %v2792_v51 = vpop.f32.mrf.mxu1 }
0x1c34   : > { %v2793_v52 = vadd.f32 %v2792_v51, %v2719_v50 }
0x1c35   : > { %v3262_v53 = vpop.f32.mrf.mxu1 }
0x1c36   : > { %2798 = vst.msk [vmem:[%s650_s21 + $0x8] sm:$0xff] %vm2796_vm14, %v2793_v52 }
0x1c37 PF: > { %p30_p12 = scmp.ge.s32.totalorder %s3993_s0, 4   ;;  %s4391_s21 = smov %s3748_s22 }
0x1c38   : > { %s4392_s22 = smov %s3752_s23  ;;  %s4393_s23 = smov %s4005_s30 }
0x1c39   : > { %s4394_s24 = smov %s3993_s0  ;;  %32 = sbr.rel (!%p30_p12) target bundleno = 16 (0x10), region = 170 }
0x1c3e   :  { %2820 = vsyncpa [#allocation3], 1 }
0x1c3f   :  { %2822 = vsyncpa [#allocation3 + $0x1], 1 }
0x1c40   :  { %2823 = vsyncpa [#allocation5], 1 }
0x1c41   :  { %2824 = vsyncpa [#allocation8], 1 }
0x1c42   :  { %2825 = vsyncpa [#allocation11], 1 }
0x1c43   :  { %2826 = vsyncpa [#allocation14], 1 }

</bundles_post_ra>
